<compile_context>
chip_gen: v7x
topology: tpu7x:2x2x1
jax: 0.10.0
libtpu: 0.0.40
codegen_flags: <defaults>
</compile_context>

<pallas_src>
import jax
import jax.numpy as jnp
from jax.experimental import pallas as pl
from jax.experimental.pallas import tpu as pltpu

# ----------------------------- configuration --------------------------------
BATCH = 2
NUM_POINTS = 128                 # lane-friendly
EXTRA_FEATURE_CHANNELS = 3       # -> in_channels = 6
NUM_SHAPES = 4                   # one-hot shape id channels
NUM_CLASSES = 5
IN_CHANNELS = 3 + EXTRA_FEATURE_CHANNELS            # 6
INPUT_CHANNELS = IN_CHANNELS + NUM_SHAPES            # 10 (with_one_hot_shape_id=True)

# lightweight SA shared-MLP widths (each SA consumes concat([features, coords]) = 6 ch)
SA_MLPS = [[32, 32], [32, 64]]
# classifier widths (width-multiplied-down version of [512, 256, 128, num_classes])
CLS_HIDDEN = [64, 32, 16]

LANE_TILE = 128                  # lane tile of the fused kernel (multiple of 128)
OUT_PAD = 8                      # final Cout padded 5 -> 8 for an unmasked store


# ------------------------------ Pallas kernel --------------------------------
def _fused_pointnet2_kernel(
    x_ref,
    sa1_w0, sa1_b0, sa1_w1, sa1_b1,
    sa2_w0, sa2_b0, sa2_w1, sa2_b1,
    c1_wx, c1_w1, c1_w2, c1_b,
    c2_w, c2_b, c3_w, c3_b, c4_w, c4_b,
    o_ref,
):
    """Whole PointNet2 forward for one lane tile.  x_ref: (INPUT_CHANNELS, LT)."""
    x = x_ref[...]

    def mm(w_ref, a):
        return jnp.dot(w_ref[...], a, preferred_element_type=jnp.float32)

    # SA block 1: shared MLP on concat([feats, coords]) (permutation folded into W).
    h = jnp.maximum(mm(sa1_w0, x) + sa1_b0[...], 0.0)
    sa1 = jnp.maximum(mm(sa1_w1, h) + sa1_b1[...], 0.0)

    # SA block 2: same input (reference forward always feeds (feats0, coords0)).
    h = jnp.maximum(mm(sa2_w0, x) + sa2_b0[...], 0.0)
    sa2 = jnp.maximum(mm(sa2_w1, h) + sa2_b1[...], 0.0)

    # Classifier layer 1: concat([x_one_hot, sa1, sa2]) matmul decomposed into
    # three column-block matmuls -> no concat buffer / sublane shifting needed.
    y = mm(c1_wx, x) + mm(c1_w1, sa1) + mm(c1_w2, sa2) + c1_b[...]
    y = jnp.maximum(y, 0.0)
    y = jnp.maximum(mm(c2_w, y) + c2_b[...], 0.0)
    y = jnp.maximum(mm(c3_w, y) + c3_b[...], 0.0)

    # Final layer: bias only (no BN / ReLU), Cout padded to 8 sublanes.
    o_ref[...] = (mm(c4_w, y) + c4_b[...]).astype(o_ref.dtype)


def pointnet2_forward(inputs, fused_params):
    """inputs: (B, INPUT_CHANNELS, N) -> logits (B, NUM_CLASSES, N)."""
    B, C, N = inputs.shape
    L = B * N
    assert L % LANE_TILE == 0
    n_tiles = L // LANE_TILE

    # Fold batch into the lane axis: (B, C, N) -> (C, B*N).
    x2d = jnp.transpose(inputs, (1, 0, 2)).reshape(C, L)

    in_specs = [pl.BlockSpec((C, LANE_TILE), lambda l: (0, l))]
    for p in fused_params:
        in_specs.append(pl.BlockSpec(p.shape, lambda l: (0, 0)))  # VMEM-resident

    out = pl.pallas_call(
        _fused_pointnet2_kernel,
        out_shape=jax.ShapeDtypeStruct((OUT_PAD, L), jnp.float32),
        grid=(n_tiles,),
        in_specs=in_specs,
        out_specs=pl.BlockSpec((OUT_PAD, LANE_TILE), lambda l: (0, l)),
        compiler_params=pltpu.CompilerParams(dimension_semantics=("parallel",)),
    )(x2d, *fused_params)

    return out[:NUM_CLASSES].reshape(NUM_CLASSES, B, N).transpose(1, 0, 2)


# ---------------------------- parameter init ---------------------------------
def _init_conv_bn(key, cin, cout, with_bn=True):
    """Deterministic Conv1d(1x1)+BN(eval) params, BN folded into (scale, shift)."""
    kw, kb, kg, kbt, km, kv = jax.random.split(key, 6)
    w = (0.1 * jax.random.normal(kw, (cout, cin))).astype(jnp.float32)
    b = (0.01 * jax.random.normal(kb, (cout,))).astype(jnp.float32)
    if with_bn:
        gamma = 1.0 + 0.1 * jax.random.normal(kg, (cout,))
        beta = 0.1 * jax.random.normal(kbt, (cout,))
        mean = 0.1 * jax.random.normal(km, (cout,))
        var = 0.5 + jax.random.uniform(kv, (cout,))
        eps = 1e-5
        s = gamma / jnp.sqrt(var + eps)
        t = beta - mean * s
    else:
        s = jnp.ones((cout,))
        t = jnp.zeros((cout,))
    # y = (W x + b) * s + t  =  (s*W) x + (b * s + t)
    scale = s.reshape(cout, 1).astype(jnp.float32)
    shift = (b * s + t).reshape(cout, 1).astype(jnp.float32)
    return (w, scale, shift)


def init_params(key):
    params = {"sa_layers": [], "classifier": []}
    for mlp in SA_MLPS:
        key, sub = jax.random.split(key)
        layers, cin = [], IN_CHANNELS
        for cout in mlp:
            sub, k = jax.random.split(sub)
            layers.append(_init_conv_bn(k, cin, cout, with_bn=True))
            cin = cout
        params["sa_layers"].append(layers)
    cat_channels = INPUT_CHANNELS + sum(m[-1] for m in SA_MLPS)
    cin = cat_channels
    for cout in CLS_HIDDEN:
        key, k = jax.random.split(key)
        params["classifier"].append(_init_conv_bn(k, cin, cout, with_bn=True))
        cin = cout
    key, k = jax.random.split(key)
    params["classifier"].append(_init_conv_bn(k, cin, NUM_CLASSES, with_bn=False))
    return params


def prepare_fused_params(params):
    """Fold BN scale into W, fold SA-input permutation / classifier concat into W."""
    def fold(w, scale, shift):
        return (w * scale).astype(jnp.float32), shift.astype(jnp.float32)

    ops = []
    # SA blocks: layer 0 sees concat([feats (x[3:6]), coords (x[0:3])]); fold that
    # permutation + zero one-hot columns into a (Cout, INPUT_CHANNELS) weight so the
    # kernel matmuls directly against the full input tile.
    for sa_layers in params["sa_layers"]:
        (w0, s0, b0) = sa_layers[0]
        w0f, b0f = fold(w0, s0, b0)
        w10 = jnp.zeros((w0f.shape[0], INPUT_CHANNELS), jnp.float32)
        w10 = w10.at[:, 0:3].set(w0f[:, 3:6])   # coords columns -> x[0:3]
        w10 = w10.at[:, 3:6].set(w0f[:, 0:3])   # feats  columns -> x[3:6]
        ops += [w10, b0f]
        for (w, s, b) in sa_layers[1:]:
            wf, bf = fold(w, s, b)
            ops += [wf, bf]

    # Classifier layer 1: split the concat([x, sa1, sa2]) contraction into 3 blocks.
    (w1, s1, b1) = params["classifier"][0]
    w1f, b1f = fold(w1, s1, b1)
    c0 = INPUT_CHANNELS
    c1 = c0 + SA_MLPS[0][-1]
    c2 = c1 + SA_MLPS[1][-1]
    ops += [w1f[:, :c0], w1f[:, c0:c1], w1f[:, c1:c2], b1f]

    for (w, s, b) in params["classifier"][1:-1]:
        wf, bf = fold(w, s, b)
        ops += [wf, bf]

    # Final layer: pad Cout 5 -> 8 for an unmasked sublane store.
    (w_last, s_last, b_last) = params["classifier"][-1]
    wlf, blf = fold(w_last, s_last, b_last)
    pad = OUT_PAD - NUM_CLASSES
    ops += [jnp.pad(wlf, ((0, pad), (0, 0))), jnp.pad(blf, ((0, pad), (0, 0)))]

    assert len(ops) == 18
    return ops


# --------------------------- pure-JAX reference -------------------------------
def _conv_bn_relu_ref(x, w, scale, shift, relu):
    y = jnp.einsum("oi,bin->bon", w, x, precision=jax.lax.Precision.HIGHEST)
    y = y * scale[None] + shift[None]
    return jnp.maximum(y, 0.0) if relu else y


def pointnet2_forward_reference(inputs, params):
    features = inputs[:, :IN_CHANNELS, :]
    features_with_one_hot = inputs
    coords = features[:, :3, :]
    feats = features[:, 3:, :]
    in_features_list, coords_list = [], []
    cur_feats, cur_coords = feats, coords
    for sa_layers in params["sa_layers"]:
        in_features_list.append(cur_feats)
        coords_list.append(cur_coords)
        x = jnp.concatenate([in_features_list[0], coords_list[0]], axis=1)
        for (w, scale, shift) in sa_layers:
            x = _conv_bn_relu_ref(x, w, scale, shift, True)
        cur_feats, cur_coords = x, coords_list[0]
    in_features_list.append(cur_feats)
    in_features_list[0] = features_with_one_hot
    x = jnp.concatenate(in_features_list, axis=1)
    n = len(params["classifier"])
    for i, (w, scale, shift) in enumerate(params["classifier"]):
        x = _conv_bn_relu_ref(x, w, scale, shift, i < n - 1)
    return x


# ---------------------------------- main --------------------------------------
if __name__ == "__main__":
    root = jax.random.PRNGKey(0)
    k_params, k_in = jax.random.split(root)
    params = init_params(k_params)
    fused = prepare_fused_params(params)
    inputs = jax.random.normal(
        k_in, (BATCH, INPUT_CHANNELS, NUM_POINTS), dtype=jnp.float32
    )

    fwd = jax.jit(lambda x: pointnet2_forward(x, fused))
    out = fwd(inputs)
    jax.block_until_ready(out)

    assert out.shape == (BATCH, NUM_CLASSES, NUM_POINTS), out.shape
    assert bool(jnp.all(jnp.isfinite(out)))

    # Correctness check against a pure-JAX mirror of the reference forward.
    ref = pointnet2_forward_reference(inputs, params)
    max_err = float(jnp.max(jnp.abs(out - ref)))
    assert max_err < 5e-2, max_err

    print("KERNEL_OK")
</pallas_src>

<mosaic_0001>
module attributes {stable_mosaic.version = 11 : i64} {
  func.func @_fused_pointnet2_kernel(%arg0: i32, %arg1: memref<10x128xf32, #tpu.memory_space<vmem>>, %arg2: memref<32x10xf32, #tpu.memory_space<vmem>>, %arg3: memref<32x1xf32, #tpu.memory_space<vmem>>, %arg4: memref<32x32xf32, #tpu.memory_space<vmem>>, %arg5: memref<32x1xf32, #tpu.memory_space<vmem>>, %arg6: memref<32x10xf32, #tpu.memory_space<vmem>>, %arg7: memref<32x1xf32, #tpu.memory_space<vmem>>, %arg8: memref<64x32xf32, #tpu.memory_space<vmem>>, %arg9: memref<64x1xf32, #tpu.memory_space<vmem>>, %arg10: memref<64x10xf32, #tpu.memory_space<vmem>>, %arg11: memref<64x32xf32, #tpu.memory_space<vmem>>, %arg12: memref<64x64xf32, #tpu.memory_space<vmem>>, %arg13: memref<64x1xf32, #tpu.memory_space<vmem>>, %arg14: memref<32x64xf32, #tpu.memory_space<vmem>>, %arg15: memref<32x1xf32, #tpu.memory_space<vmem>>, %arg16: memref<16x32xf32, #tpu.memory_space<vmem>>, %arg17: memref<16x1xf32, #tpu.memory_space<vmem>>, %arg18: memref<8x16xf32, #tpu.memory_space<vmem>>, %arg19: memref<8x1xf32, #tpu.memory_space<vmem>>, %arg20: memref<8x128xf32, #tpu.memory_space<vmem>>) attributes {dimension_semantics = [#tpu.dimension_semantics<parallel>], iteration_bounds = array<i64: 2>, scalar_prefetch = 0 : i64, scratch_operands = 0 : i64, tpu.core_type = #tpu.core_type<tc>, window_params = [{transform_indices = @transform_0, window_bounds = array<i64: 10, 128>}, {pipeline_mode = #tpu.pipeline_mode<synchronous>, transform_indices = @transform_1, window_bounds = array<i64: 32, 10>}, {pipeline_mode = #tpu.pipeline_mode<synchronous>, transform_indices = @transform_2, window_bounds = array<i64: 32, 1>}, {pipeline_mode = #tpu.pipeline_mode<synchronous>, transform_indices = @transform_3, window_bounds = array<i64: 32, 32>}, {pipeline_mode = #tpu.pipeline_mode<synchronous>, transform_indices = @transform_4, window_bounds = array<i64: 32, 1>}, {pipeline_mode = #tpu.pipeline_mode<synchronous>, transform_indices = @transform_5, window_bounds = array<i64: 32, 10>}, {pipeline_mode = #tpu.pipeline_mode<synchronous>, transform_indices = @transform_6, window_bounds = array<i64: 32, 1>}, {pipeline_mode = #tpu.pipeline_mode<synchronous>, transform_indices = @transform_7, window_bounds = array<i64: 64, 32>}, {pipeline_mode = #tpu.pipeline_mode<synchronous>, transform_indices = @transform_8, window_bounds = array<i64: 64, 1>}, {pipeline_mode = #tpu.pipeline_mode<synchronous>, transform_indices = @transform_9, window_bounds = array<i64: 64, 10>}, {pipeline_mode = #tpu.pipeline_mode<synchronous>, transform_indices = @transform_10, window_bounds = array<i64: 64, 32>}, {pipeline_mode = #tpu.pipeline_mode<synchronous>, transform_indices = @transform_11, window_bounds = array<i64: 64, 64>}, {pipeline_mode = #tpu.pipeline_mode<synchronous>, transform_indices = @transform_12, window_bounds = array<i64: 64, 1>}, {pipeline_mode = #tpu.pipeline_mode<synchronous>, transform_indices = @transform_13, window_bounds = array<i64: 32, 64>}, {pipeline_mode = #tpu.pipeline_mode<synchronous>, transform_indices = @transform_14, window_bounds = array<i64: 32, 1>}, {pipeline_mode = #tpu.pipeline_mode<synchronous>, transform_indices = @transform_15, window_bounds = array<i64: 16, 32>}, {pipeline_mode = #tpu.pipeline_mode<synchronous>, transform_indices = @transform_16, window_bounds = array<i64: 16, 1>}, {pipeline_mode = #tpu.pipeline_mode<synchronous>, transform_indices = @transform_17, window_bounds = array<i64: 8, 16>}, {pipeline_mode = #tpu.pipeline_mode<synchronous>, transform_indices = @transform_18, window_bounds = array<i64: 8, 1>}, {transform_indices = @transform_19, window_bounds = array<i64: 8, 128>}]} {
    %c0 = arith.constant 0 : index
    %c0_0 = arith.constant 0 : index
    %0 = vector.load %arg1[%c0, %c0_0] : memref<10x128xf32, #tpu.memory_space<vmem>>, vector<10x128xf32>
    %c0_1 = arith.constant 0 : index
    %c0_2 = arith.constant 0 : index
    %1 = vector.load %arg2[%c0_1, %c0_2] : memref<32x10xf32, #tpu.memory_space<vmem>>, vector<32x10xf32>
    %cst = arith.constant dense<0.000000e+00> : vector<32x128xf32>
    %2 = tpu.matmul %1, %0, %cst {dimension_numbers = #tpu.dot_dimension_numbers<[1], [0], [0], [1], [0, 0, 1, 1], [], []>} : vector<32x10xf32>, vector<10x128xf32>, vector<32x128xf32> -> vector<32x128xf32>
    %c0_3 = arith.constant 0 : index
    %c0_4 = arith.constant 0 : index
    %3 = vector.load %arg3[%c0_3, %c0_4] : memref<32x1xf32, #tpu.memory_space<vmem>>, vector<32x1xf32>
    %4 = vector.broadcast %3 : vector<32x1xf32> to vector<32x128xf32>
    %5 = arith.addf %2, %4 : vector<32x128xf32>
    %cst_5 = arith.constant 0.000000e+00 : f32
    %6 = vector.broadcast %cst_5 : f32 to vector<32x128xf32>
    %7 = arith.maximumf %5, %6 : vector<32x128xf32>
    %c0_6 = arith.constant 0 : index
    %c0_7 = arith.constant 0 : index
    %8 = vector.load %arg4[%c0_6, %c0_7] : memref<32x32xf32, #tpu.memory_space<vmem>>, vector<32x32xf32>
    %cst_8 = arith.constant dense<0.000000e+00> : vector<32x128xf32>
    %9 = tpu.matmul %8, %7, %cst_8 {dimension_numbers = #tpu.dot_dimension_numbers<[1], [0], [0], [1], [0, 0, 1, 1], [], []>} : vector<32x32xf32>, vector<32x128xf32>, vector<32x128xf32> -> vector<32x128xf32>
    %c0_9 = arith.constant 0 : index
    %c0_10 = arith.constant 0 : index
    %10 = vector.load %arg5[%c0_9, %c0_10] : memref<32x1xf32, #tpu.memory_space<vmem>>, vector<32x1xf32>
    %11 = vector.broadcast %10 : vector<32x1xf32> to vector<32x128xf32>
    %12 = arith.addf %9, %11 : vector<32x128xf32>
    %cst_11 = arith.constant 0.000000e+00 : f32
    %13 = vector.broadcast %cst_11 : f32 to vector<32x128xf32>
    %14 = arith.maximumf %12, %13 : vector<32x128xf32>
    %c0_12 = arith.constant 0 : index
    %c0_13 = arith.constant 0 : index
    %15 = vector.load %arg6[%c0_12, %c0_13] : memref<32x10xf32, #tpu.memory_space<vmem>>, vector<32x10xf32>
    %cst_14 = arith.constant dense<0.000000e+00> : vector<32x128xf32>
    %16 = tpu.matmul %15, %0, %cst_14 {dimension_numbers = #tpu.dot_dimension_numbers<[1], [0], [0], [1], [0, 0, 1, 1], [], []>} : vector<32x10xf32>, vector<10x128xf32>, vector<32x128xf32> -> vector<32x128xf32>
    %c0_15 = arith.constant 0 : index
    %c0_16 = arith.constant 0 : index
    %17 = vector.load %arg7[%c0_15, %c0_16] : memref<32x1xf32, #tpu.memory_space<vmem>>, vector<32x1xf32>
    %18 = vector.broadcast %17 : vector<32x1xf32> to vector<32x128xf32>
    %19 = arith.addf %16, %18 : vector<32x128xf32>
    %cst_17 = arith.constant 0.000000e+00 : f32
    %20 = vector.broadcast %cst_17 : f32 to vector<32x128xf32>
    %21 = arith.maximumf %19, %20 : vector<32x128xf32>
    %c0_18 = arith.constant 0 : index
    %c0_19 = arith.constant 0 : index
    %22 = vector.load %arg8[%c0_18, %c0_19] : memref<64x32xf32, #tpu.memory_space<vmem>>, vector<64x32xf32>
    %cst_20 = arith.constant dense<0.000000e+00> : vector<64x128xf32>
    %23 = tpu.matmul %22, %21, %cst_20 {dimension_numbers = #tpu.dot_dimension_numbers<[1], [0], [0], [1], [0, 0, 1, 1], [], []>} : vector<64x32xf32>, vector<32x128xf32>, vector<64x128xf32> -> vector<64x128xf32>
    %c0_21 = arith.constant 0 : index
    %c0_22 = arith.constant 0 : index
    %24 = vector.load %arg9[%c0_21, %c0_22] : memref<64x1xf32, #tpu.memory_space<vmem>>, vector<64x1xf32>
    %25 = vector.broadcast %24 : vector<64x1xf32> to vector<64x128xf32>
    %26 = arith.addf %23, %25 : vector<64x128xf32>
    %cst_23 = arith.constant 0.000000e+00 : f32
    %27 = vector.broadcast %cst_23 : f32 to vector<64x128xf32>
    %28 = arith.maximumf %26, %27 : vector<64x128xf32>
    %c0_24 = arith.constant 0 : index
    %c0_25 = arith.constant 0 : index
    %29 = vector.load %arg10[%c0_24, %c0_25] : memref<64x10xf32, #tpu.memory_space<vmem>>, vector<64x10xf32>
    %cst_26 = arith.constant dense<0.000000e+00> : vector<64x128xf32>
    %30 = tpu.matmul %29, %0, %cst_26 {dimension_numbers = #tpu.dot_dimension_numbers<[1], [0], [0], [1], [0, 0, 1, 1], [], []>} : vector<64x10xf32>, vector<10x128xf32>, vector<64x128xf32> -> vector<64x128xf32>
    %c0_27 = arith.constant 0 : index
    %c0_28 = arith.constant 0 : index
    %31 = vector.load %arg11[%c0_27, %c0_28] : memref<64x32xf32, #tpu.memory_space<vmem>>, vector<64x32xf32>
    %cst_29 = arith.constant dense<0.000000e+00> : vector<64x128xf32>
    %32 = tpu.matmul %31, %14, %cst_29 {dimension_numbers = #tpu.dot_dimension_numbers<[1], [0], [0], [1], [0, 0, 1, 1], [], []>} : vector<64x32xf32>, vector<32x128xf32>, vector<64x128xf32> -> vector<64x128xf32>
    %33 = arith.addf %30, %32 : vector<64x128xf32>
    %c0_30 = arith.constant 0 : index
    %c0_31 = arith.constant 0 : index
    %34 = vector.load %arg12[%c0_30, %c0_31] : memref<64x64xf32, #tpu.memory_space<vmem>>, vector<64x64xf32>
    %cst_32 = arith.constant dense<0.000000e+00> : vector<64x128xf32>
    %35 = tpu.matmul %34, %28, %cst_32 {dimension_numbers = #tpu.dot_dimension_numbers<[1], [0], [0], [1], [0, 0, 1, 1], [], []>} : vector<64x64xf32>, vector<64x128xf32>, vector<64x128xf32> -> vector<64x128xf32>
    %36 = arith.addf %33, %35 : vector<64x128xf32>
    %c0_33 = arith.constant 0 : index
    %c0_34 = arith.constant 0 : index
    %37 = vector.load %arg13[%c0_33, %c0_34] : memref<64x1xf32, #tpu.memory_space<vmem>>, vector<64x1xf32>
    %38 = vector.broadcast %37 : vector<64x1xf32> to vector<64x128xf32>
    %39 = arith.addf %36, %38 : vector<64x128xf32>
    %cst_35 = arith.constant 0.000000e+00 : f32
    %40 = vector.broadcast %cst_35 : f32 to vector<64x128xf32>
    %41 = arith.maximumf %39, %40 : vector<64x128xf32>
    %c0_36 = arith.constant 0 : index
    %c0_37 = arith.constant 0 : index
    %42 = vector.load %arg14[%c0_36, %c0_37] : memref<32x64xf32, #tpu.memory_space<vmem>>, vector<32x64xf32>
    %cst_38 = arith.constant dense<0.000000e+00> : vector<32x128xf32>
    %43 = tpu.matmul %42, %41, %cst_38 {dimension_numbers = #tpu.dot_dimension_numbers<[1], [0], [0], [1], [0, 0, 1, 1], [], []>} : vector<32x64xf32>, vector<64x128xf32>, vector<32x128xf32> -> vector<32x128xf32>
    %c0_39 = arith.constant 0 : index
    %c0_40 = arith.constant 0 : index
    %44 = vector.load %arg15[%c0_39, %c0_40] : memref<32x1xf32, #tpu.memory_space<vmem>>, vector<32x1xf32>
    %45 = vector.broadcast %44 : vector<32x1xf32> to vector<32x128xf32>
    %46 = arith.addf %43, %45 : vector<32x128xf32>
    %cst_41 = arith.constant 0.000000e+00 : f32
    %47 = vector.broadcast %cst_41 : f32 to vector<32x128xf32>
    %48 = arith.maximumf %46, %47 : vector<32x128xf32>
    %c0_42 = arith.constant 0 : index
    %c0_43 = arith.constant 0 : index
    %49 = vector.load %arg16[%c0_42, %c0_43] : memref<16x32xf32, #tpu.memory_space<vmem>>, vector<16x32xf32>
    %cst_44 = arith.constant dense<0.000000e+00> : vector<16x128xf32>
    %50 = tpu.matmul %49, %48, %cst_44 {dimension_numbers = #tpu.dot_dimension_numbers<[1], [0], [0], [1], [0, 0, 1, 1], [], []>} : vector<16x32xf32>, vector<32x128xf32>, vector<16x128xf32> -> vector<16x128xf32>
    %c0_45 = arith.constant 0 : index
    %c0_46 = arith.constant 0 : index
    %51 = vector.load %arg17[%c0_45, %c0_46] : memref<16x1xf32, #tpu.memory_space<vmem>>, vector<16x1xf32>
    %52 = vector.broadcast %51 : vector<16x1xf32> to vector<16x128xf32>
    %53 = arith.addf %50, %52 : vector<16x128xf32>
    %cst_47 = arith.constant 0.000000e+00 : f32
    %54 = vector.broadcast %cst_47 : f32 to vector<16x128xf32>
    %55 = arith.maximumf %53, %54 : vector<16x128xf32>
    %c0_48 = arith.constant 0 : index
    %c0_49 = arith.constant 0 : index
    %56 = vector.load %arg18[%c0_48, %c0_49] : memref<8x16xf32, #tpu.memory_space<vmem>>, vector<8x16xf32>
    %cst_50 = arith.constant dense<0.000000e+00> : vector<8x128xf32>
    %57 = tpu.matmul %56, %55, %cst_50 {dimension_numbers = #tpu.dot_dimension_numbers<[1], [0], [0], [1], [0, 0, 1, 1], [], []>} : vector<8x16xf32>, vector<16x128xf32>, vector<8x128xf32> -> vector<8x128xf32>
    %c0_51 = arith.constant 0 : index
    %c0_52 = arith.constant 0 : index
    %58 = vector.load %arg19[%c0_51, %c0_52] : memref<8x1xf32, #tpu.memory_space<vmem>>, vector<8x1xf32>
    %59 = vector.broadcast %58 : vector<8x1xf32> to vector<8x128xf32>
    %60 = arith.addf %57, %59 : vector<8x128xf32>
    %c0_53 = arith.constant 0 : index
    %c0_54 = arith.constant 0 : index
    %61 = vector.load %arg20[%c0_53, %c0_54] : memref<8x128xf32, #tpu.memory_space<vmem>>, vector<8x128xf32>
    tpu.vector_store %arg20[%c0_53, %c0_54], %60 {strides = array<i32>} : memref<8x128xf32, #tpu.memory_space<vmem>>, vector<8x128xf32>,
    return
  }
  func.func @transform_0(%arg0: i32) -> (i32, i32) {
    %c0_i32 = arith.constant 0 : i32
    %c0_i32_0 = arith.constant 0 : i32
    return %c0_i32, %arg0 : i32, i32
  }
  func.func @transform_1(%arg0: i32) -> (i32, i32) {
    %c0_i32 = arith.constant 0 : i32
    %c0_i32_0 = arith.constant 0 : i32
    %c0_i32_1 = arith.constant 0 : i32
    return %c0_i32, %c0_i32_0 : i32, i32
  }
  func.func @transform_2(%arg0: i32) -> (i32, i32) {
    %c0_i32 = arith.constant 0 : i32
    %c0_i32_0 = arith.constant 0 : i32
    %c0_i32_1 = arith.constant 0 : i32
    return %c0_i32, %c0_i32_0 : i32, i32
  }
  func.func @transform_3(%arg0: i32) -> (i32, i32) {
    %c0_i32 = arith.constant 0 : i32
    %c0_i32_0 = arith.constant 0 : i32
    %c0_i32_1 = arith.constant 0 : i32
    return %c0_i32, %c0_i32_0 : i32, i32
  }
  func.func @transform_4(%arg0: i32) -> (i32, i32) {
    %c0_i32 = arith.constant 0 : i32
    %c0_i32_0 = arith.constant 0 : i32
    %c0_i32_1 = arith.constant 0 : i32
    return %c0_i32, %c0_i32_0 : i32, i32
  }
  func.func @transform_5(%arg0: i32) -> (i32, i32) {
    %c0_i32 = arith.constant 0 : i32
    %c0_i32_0 = arith.constant 0 : i32
    %c0_i32_1 = arith.constant 0 : i32
    return %c0_i32, %c0_i32_0 : i32, i32
  }
  func.func @transform_6(%arg0: i32) -> (i32, i32) {
    %c0_i32 = arith.constant 0 : i32
    %c0_i32_0 = arith.constant 0 : i32
    %c0_i32_1 = arith.constant 0 : i32
    return %c0_i32, %c0_i32_0 : i32, i32
  }
  func.func @transform_7(%arg0: i32) -> (i32, i32) {
    %c0_i32 = arith.constant 0 : i32
    %c0_i32_0 = arith.constant 0 : i32
    %c0_i32_1 = arith.constant 0 : i32
    return %c0_i32, %c0_i32_0 : i32, i32
  }
  func.func @transform_8(%arg0: i32) -> (i32, i32) {
    %c0_i32 = arith.constant 0 : i32
    %c0_i32_0 = arith.constant 0 : i32
    %c0_i32_1 = arith.constant 0 : i32
    return %c0_i32, %c0_i32_0 : i32, i32
  }
  func.func @transform_9(%arg0: i32) -> (i32, i32) {
    %c0_i32 = arith.constant 0 : i32
    %c0_i32_0 = arith.constant 0 : i32
    %c0_i32_1 = arith.constant 0 : i32
    return %c0_i32, %c0_i32_0 : i32, i32
  }
  func.func @transform_10(%arg0: i32) -> (i32, i32) {
    %c0_i32 = arith.constant 0 : i32
    %c0_i32_0 = arith.constant 0 : i32
    %c0_i32_1 = arith.constant 0 : i32
    return %c0_i32, %c0_i32_0 : i32, i32
  }
  func.func @transform_11(%arg0: i32) -> (i32, i32) {
    %c0_i32 = arith.constant 0 : i32
    %c0_i32_0 = arith.constant 0 : i32
    %c0_i32_1 = arith.constant 0 : i32
    return %c0_i32, %c0_i32_0 : i32, i32
  }
  func.func @transform_12(%arg0: i32) -> (i32, i32) {
    %c0_i32 = arith.constant 0 : i32
    %c0_i32_0 = arith.constant 0 : i32
    %c0_i32_1 = arith.constant 0 : i32
    return %c0_i32, %c0_i32_0 : i32, i32
  }
  func.func @transform_13(%arg0: i32) -> (i32, i32) {
    %c0_i32 = arith.constant 0 : i32
    %c0_i32_0 = arith.constant 0 : i32
    %c0_i32_1 = arith.constant 0 : i32
    return %c0_i32, %c0_i32_0 : i32, i32
  }
  func.func @transform_14(%arg0: i32) -> (i32, i32) {
    %c0_i32 = arith.constant 0 : i32
    %c0_i32_0 = arith.constant 0 : i32
    %c0_i32_1 = arith.constant 0 : i32
    return %c0_i32, %c0_i32_0 : i32, i32
  }
  func.func @transform_15(%arg0: i32) -> (i32, i32) {
    %c0_i32 = arith.constant 0 : i32
    %c0_i32_0 = arith.constant 0 : i32
    %c0_i32_1 = arith.constant 0 : i32
    return %c0_i32, %c0_i32_0 : i32, i32
  }
  func.func @transform_16(%arg0: i32) -> (i32, i32) {
    %c0_i32 = arith.constant 0 : i32
    %c0_i32_0 = arith.constant 0 : i32
    %c0_i32_1 = arith.constant 0 : i32
    return %c0_i32, %c0_i32_0 : i32, i32
  }
  func.func @transform_17(%arg0: i32) -> (i32, i32) {
    %c0_i32 = arith.constant 0 : i32
    %c0_i32_0 = arith.constant 0 : i32
    %c0_i32_1 = arith.constant 0 : i32
    return %c0_i32, %c0_i32_0 : i32, i32
  }
  func.func @transform_18(%arg0: i32) -> (i32, i32) {
    %c0_i32 = arith.constant 0 : i32
    %c0_i32_0 = arith.constant 0 : i32
    %c0_i32_1 = arith.constant 0 : i32
    return %c0_i32, %c0_i32_0 : i32, i32
  }
  func.func @transform_19(%arg0: i32) -> (i32, i32) {
    %c0_i32 = arith.constant 0 : i32
    %c0_i32_0 = arith.constant 0 : i32
    return %c0_i32, %arg0 : i32, i32
  }
}

</mosaic_0001>

<bundles_post_ra>
// kernel: _lambda_.1
= control target key start
LH: loop header
LB: loop body
LE: loop exit
PB: predicated region body
PF: predicated region fallthrough
CT: control target
= control target key end

     0   :  { %s3994_s0 = inlined_call_operand.vmem [shape: f32[10,256], index: 0, kind: input, shape index: {}]   ;;  %s3995_s1 = inlined_call_operand.hbm [shape: f32[32,10], index: 1, kind: input, shape index: {}]   ;;  %s3996_s2 = inlined_call_operand.hbm [shape: f32[32,1], index: 2, kind: input, shape index: {}]   ;;  %s3997_s3 = inlined_call_operand.hbm [shape: f32[32,32], index: 3, kind: input, shape index: {}]   ;;  %s3998_s4 = inlined_call_operand.hbm [shape: f32[32,1], index: 4, kind: input, shape index: {}]   ;;  %s3999_s5 = inlined_call_operand.hbm [shape: f32[32,10], index: 5, kind: input, shape index: {}]   ;;  %s4000_s6 = inlined_call_operand.hbm [shape: f32[32,1], index: 6, kind: input, shape index: {}]   ;;  %s4001_s7 = inlined_call_operand.hbm [shape: f32[64,32], index: 7, kind: input, shape index: {}]   ;;  %s4002_s8 = inlined_call_operand.hbm [shape: f32[64,1], index: 8, kind: input, shape index: {}]   ;;  %s4003_s9 = inlined_call_operand.hbm [shape: f32[64,10], index: 9, kind: input, shape index: {}]   ;;  %s4004_s10 = inlined_call_operand.hbm [shape: f32[64,32], index: 10, kind: input, shape index: {}]   ;;  %s4005_s11 = inlined_call_operand.vmem [shape: f32[64,64], index: 11, kind: input, shape index: {}]   ;;  %s4006_s12 = inlined_call_operand.vmem [shape: f32[64,1], index: 12, kind: input, shape index: {}]   ;;  %s4007_s13 = inlined_call_operand.hbm [shape: f32[32,64], index: 13, kind: input, shape index: {}]   ;;  %s4008_s14 = inlined_call_operand.vmem [shape: f32[32,1], index: 14, kind: input, shape index: {}]   ;;  %s4009_s15 = inlined_call_operand.hbm [shape: f32[16,32], index: 15, kind: input, shape index: {}]   ;;  %s4010_s16 = inlined_call_operand.vmem [shape: f32[16,1], index: 16, kind: input, shape index: {}]   ;;  %s4011_s17 = inlined_call_operand.vmem [shape: f32[8,16], index: 17, kind: input, shape index: {}]   ;;  %s4012_s18 = inlined_call_operand.vmem [shape: f32[8,1], index: 18, kind: input, shape index: {}]   ;;  %s4013_s19 = inlined_call_operand.vmem [shape: f32[8,256], index: 19, kind: output, shape index: {}]  }
   0x1   :  { %4027 = sst [smem:[#allocation32_spill]] %s3994_s0 }
   0x2   :  { %4028 = sst [smem:[#allocation33_spill]] %s3995_s1 }
   0x3   :  { %4029 = sst [smem:[#allocation34_spill]] %s3996_s2 }
   0x4   :  { %4030 = sst [smem:[#allocation35_spill]] %s3997_s3 }
   0x5   :  { %4031 = sst [smem:[#allocation36_spill]] %s3998_s4 }
   0x6   :  { %4032 = sst [smem:[#allocation37_spill]] %s4000_s6 }
   0x7   :  { %4033 = sst [smem:[#allocation38_spill]] %s4002_s8 }
   0x8   :  { %4034 = sst [smem:[#allocation39_spill]] %s4005_s11 }
   0x9   :  { %4035 = sst [smem:[#allocation40_spill]] %s4006_s12 }
   0xa   :  { %4036 = sst [smem:[#allocation41_spill]] %s4008_s14 }
   0xb   :  { %4037 = sst [smem:[#allocation42_spill]] %s4010_s16 }
   0xc   :  { %4038 = sst [smem:[#allocation43_spill]] %s4011_s17 }
   0xd   :  { %4039 = sst [smem:[#allocation44_spill]] %s4012_s18 }
   0xe   :  { %4040 = sst [smem:[#allocation45_spill]] %s4013_s19 }
   0xf   :  { %24 = vsyncpa [#allocation4], 0 }
  0x10   :  { %25 = vsyncpa [#allocation6], 0 }
  0x11   :  { %26 = vsyncpa [#allocation9], 0 }
  0x12   :  { %27 = vsyncpa [#allocation12], 0 }
  0x13   :  { %28 = vsyncpa [#allocation15], 0 }
  0x14   :  { %29 = vsyncpa [#allocation18], 0 }
  0x15   :  { %30 = vsyncpa [#allocation21], 0  ;;  %s3470_s0 = smov 0   ;;  %s3472_s30 = smov 0  }
  0x16   :  { %s3474_s20 = smov 0  }
  0x17 LB: > { %s3486_s21 = sadd.s32 4294967295, %s3349_s20   ;;  %s3489_s1 = sadd.s32 1, %s3349_s20   ;;  %s3349_s20 = sphi %s3474_s20, %s4082_s20   ;;  %s3345_s30 = sphi %s3472_s30, %s4085_s30   ;;  %s3341_s0 = sphi %s3470_s0, %s4084_s0  }
  0x18   : > { %4041 = sst [smem:[#allocation29_spill]] %s3486_s21  ;;  %s40_s22 = ssub.s32 %s3349_s20, %s3489_s1 }
  0x19   : > { %4042 = sst [smem:[#allocation30_spill]] %s3489_s1  ;;  %s43_s2 = sadd.s32 1, %s3345_s30 }
  0x1a   : > { %p41_p0 = scmp.eq.s32.totalorder %s40_s22, 0  ;;  %p50_p1 = scmp.ne.s32.totalorder %s3345_s30, %s3341_s0 }
  0x1b   : > { %p51_p2 = scmp.eq.s32.totalorder %s3349_s20, 0  ;;  %p2372_p3 = scmp.ge.s32.totalorder %s3349_s20, 1 }
  0x1c   : > { %s3499_s23 = scalar_select %p41_p0, %s3345_s30, %s43_s2  }
  0x1d   : > { %p3501_p4 = por %p51_p2, %p50_p1  ;;  %p471_p5 = scmp.lt.s32.totalorder %s3349_s20, 3 }
  0x1e   : > { %4043 = sst [smem:[#allocation31_spill]] %s3499_s23  ;;  %p4020_p6 = scmp.eq.s32.totalorder %s3486_s21, 0 }
  0x1f   : > { %s4044_s24 = scalar_select %p3501_p4, 1, 0 }
  0x20   : > { %p3507_p7 = pnand %p2372_p3, %p471_p5  ;;  %s3351_s3 = smov [#allocation5]  }
  0x21   : > { %s496_s26 = sshll.u32 %s3351_s3, 4  ;;  %s3352_s28 = smov [#allocation8]   ;;  %s3513_s26 = int_to_ptr.vmem [resolvable:$true] %s496_s26 }
  0x22   : > { %s4045_s25 = scalar_select %p3507_p7, 1, 0 }
  0x23   : > { %p2857_p8 = pneg %p3507_p7  ;;  %s522_s29 = sshll.u32 %s3352_s28, 4  ;;  %s3521_s29 = int_to_ptr.vmem [resolvable:$true] %s522_s29 }
  0x24   : > { %s3353_s22 = smov [#allocation11]   ;;  %s4047_s19 = sld [smem:[#allocation34_spill]] }
  0x25   : > { %p3517_p9 = pnand %p4020_p6, %p2857_p8  ;;  %s3523_s2 = sshll.u32 %s3353_s22, 4  ;;  %s549_s2 = int_to_ptr.vmem [resolvable:$true] %s3523_s2 }
  0x27   : > { %p3533_p11 = pneg %p3517_p9 }
  0x2a   : > { %s2963_s17 = scalar_lea.hbm %s4047_s19, 512 }
  0x2b   : > { %p2964_p10 = scmp.ne.s32.totalorder %s4047_s19, %s2963_s17  ;;  %p2970_p0 = scmp.lt.u32.totalorder %s2963_s17, %s4047_s19 }
  0x2d   : > { %p2966_p12 = pnand %p3533_p11, %p2964_p10 }
  0x2f   : > { %p2967_p13 = pneg %p2966_p12 }
  0x31   : > { %p2972_p1 = pnand %p2970_p0, %p2967_p13 }
  0x33   : > { %2975 = shalt.err (!%p2972_p1)
}
  0x34   : > { %s2976_s11 = scalar_lea.vmem %s3513_s26, 512  ;;  %p2984_p8 = scmp.lt.s32.totalorder %s3513_s26, %s3513_s26 }
  0x35   : > { %p2977_p2 = scmp.ne.s32.totalorder %s3513_s26, %s2976_s11  ;;  %p2985_p6 = scmp.lt.s32.totalorder %s2976_s11, %s2976_s11 }
  0x37   : > { %p2979_p3 = pnand %p2977_p2, %p3533_p11  ;;  %p2986_p10 = por %p2985_p6, %p2984_p8 }
  0x39   : > { %p2980_p5 = pneg %p2979_p3 }
  0x3b   : > { %p2987_p12 = pnand %p2986_p10, %p2980_p5 }
  0x3d   : > { %2990 = shalt.err (!%p2987_p12)
}
  0x3e   : > { %s3354_s1 = smov 128   ;;  %s3355_s17 = smov 8  }
  0x3f   : > { %2863 = dma.hbm_to_vmem [thread:$0]  (!%p3517_p9), %s4047_s19, 512, %s3513_s26, [#allocation6], %s3354_s1, %s3354_s1, %s3355_s17  }
  0x40   : > { %s4049_s4 = sld [smem:[#allocation36_spill]] }
  0x46   : > { %s2991_s11 = scalar_lea.hbm %s4049_s4, 512 }
  0x47   : > { %p2992_p6 = scmp.ne.s32.totalorder %s4049_s4, %s2991_s11  ;;  %p2998_p1 = scmp.lt.u32.totalorder %s2991_s11, %s4049_s4 }
  0x49   : > { %p2994_p13 = pnand %p2992_p6, %p3533_p11 }
  0x4b   : > { %p2995_p0 = pneg %p2994_p13 }
  0x4d   : > { %p3000_p2 = pnand %p2998_p1, %p2995_p0 }
  0x4f   : > { %3003 = shalt.err (!%p3000_p2)
}
  0x50   : > { %s3004_s26 = scalar_lea.vmem %s3521_s29, 512  ;;  %p3012_p10 = scmp.lt.s32.totalorder %s3521_s29, %s3521_s29 }
  0x51   : > { %p3005_p3 = scmp.ne.s32.totalorder %s3521_s29, %s3004_s26  ;;  %p3013_p12 = scmp.lt.s32.totalorder %s3004_s26, %s3004_s26 }
  0x53   : > { %p3007_p5 = pnand %p3005_p3, %p3533_p11  ;;  %p3014_p6 = por %p3013_p12, %p3012_p10 }
  0x55   : > { %p3008_p8 = pneg %p3007_p5 }
  0x57   : > { %p3015_p13 = pnand %p3014_p6, %p3008_p8 }
  0x59   : > { %3018 = shalt.err (!%p3015_p13)
}
  0x5a   : > { %2869 = dma.hbm_to_vmem [thread:$0]  (!%p3517_p9), %s4049_s4, 512, %s3521_s29, [#allocation9], %s3354_s1, %s3354_s1, %s3355_s17  }
  0x5b   : > { %s4050_s6 = sld [smem:[#allocation37_spill]] }
  0x61   : > { %s3019_s23 = scalar_lea.hbm %s4050_s6, 512 }
  0x62   : > { %p3020_p0 = scmp.ne.s32.totalorder %s4050_s6, %s3019_s23  ;;  %p3026_p3 = scmp.lt.u32.totalorder %s3019_s23, %s4050_s6 }
  0x64   : > { %p3022_p1 = pnand %p3020_p0, %p3533_p11 }
  0x66   : > { %p3023_p2 = pneg %p3022_p1 }
  0x68   : > { %p3028_p5 = pnand %p3026_p3, %p3023_p2 }
  0x6a   : > { %3031 = shalt.err (!%p3028_p5)
}
  0x6b   : > { %s3032_s26 = scalar_lea.vmem %s549_s2, 512  ;;  %p3040_p6 = scmp.lt.s32.totalorder %s549_s2, %s549_s2 }
  0x6c   : > { %p3033_p8 = scmp.ne.s32.totalorder %s549_s2, %s3032_s26  ;;  %p3041_p13 = scmp.lt.s32.totalorder %s3032_s26, %s3032_s26 }
  0x6e   : > { %p3035_p10 = pnand %p3033_p8, %p3533_p11  ;;  %p3042_p7 = por %p3041_p13, %p3040_p6 }
  0x70   : > { %p3036_p12 = pneg %p3035_p10 }
  0x72   : > { %p3043_p4 = pnand %p3042_p7, %p3036_p12 }
  0x74   : > { %3046 = shalt.err (!%p3043_p4)
}
  0x75   : > { %2875 = dma.hbm_to_vmem [thread:$0]  (!%p3517_p9), %s4050_s6, 512, %s549_s2, [#allocation12], %s3354_s1, %s3354_s1, %s3355_s17  }
  0x76   : > { %s3356_s14 = smov [#allocation14]   ;;  %s3357_s21 = smov [#allocation17]  }
  0x77   : > { %s574_s16 = sshll.u32 %s3356_s14, 4  ;;  %s600_s23 = sshll.u32 %s3357_s21, 4  ;;  %s575_s16 = int_to_ptr.vmem [resolvable:$true] %s574_s16  ;;  %s601_s23 = int_to_ptr.vmem [resolvable:$true] %s600_s23 }
  0x78   : > { %s4051_s8 = sld [smem:[#allocation38_spill]] }
  0x7e   : > { %s3047_s22 = scalar_lea.hbm %s4051_s8, 1024 }
  0x7f   : > { %p3048_p4 = scmp.ne.s32.totalorder %s4051_s8, %s3047_s22  ;;  %p3054_p1 = scmp.lt.u32.totalorder %s3047_s22, %s4051_s8 }
  0x81   : > { %p3050_p7 = pnand %p3048_p4, %p3533_p11 }
  0x83   : > { %p3051_p0 = pneg %p3050_p7 }
  0x85   : > { %p3056_p2 = pnand %p3054_p1, %p3051_p0 }
  0x87   : > { %3059 = shalt.err (!%p3056_p2)
}
  0x88   : > { %s3060_s2 = scalar_lea.vmem %s575_s16, 1024  ;;  %p3068_p10 = scmp.lt.s32.totalorder %s575_s16, %s575_s16 }
  0x89   : > { %p3061_p3 = scmp.ne.s32.totalorder %s575_s16, %s3060_s2  ;;  %p3069_p12 = scmp.lt.s32.totalorder %s3060_s2, %s3060_s2 }
  0x8b   : > { %p3063_p5 = pnand %p3061_p3, %p3533_p11  ;;  %p3070_p6 = por %p3069_p12, %p3068_p10 }
  0x8d   : > { %p3064_p8 = pneg %p3063_p5 }
  0x8f   : > { %p3071_p13 = pnand %p3070_p6, %p3064_p8 }
  0x91   : > { %3074 = shalt.err (!%p3071_p13)
}
  0x92   : > { %2881 = dma.hbm_to_vmem [thread:$0]  (!%p3517_p9), %s4051_s8, 1024, %s575_s16, [#allocation15], %s3354_s1, %s3354_s1, %s3355_s17  }
  0x93   : > { %s3075_s3 = scalar_lea.hbm %s4004_s10, 1024 }
  0x94   : > { %p3076_p4 = scmp.ne.s32.totalorder %s4004_s10, %s3075_s3  ;;  %p3082_p1 = scmp.lt.u32.totalorder %s3075_s3, %s4004_s10 }
  0x96   : > { %p3078_p7 = pnand %p3076_p4, %p3533_p11 }
  0x98   : > { %p3079_p0 = pneg %p3078_p7 }
  0x9a   : > { %p3084_p2 = pnand %p3082_p1, %p3079_p0 }
  0x9c   : > { %3087 = shalt.err (!%p3084_p2)
}
  0x9d   : > { %s3088_s29 = scalar_lea.vmem %s601_s23, 1024  ;;  %p3096_p10 = scmp.lt.s32.totalorder %s601_s23, %s601_s23 }
  0x9e   : > { %p3089_p3 = scmp.ne.s32.totalorder %s601_s23, %s3088_s29  ;;  %p3097_p12 = scmp.lt.s32.totalorder %s3088_s29, %s3088_s29 }
  0xa0   : > { %p3091_p5 = pnand %p3089_p3, %p3533_p11  ;;  %p3098_p6 = por %p3097_p12, %p3096_p10 }
  0xa2   : > { %p3092_p8 = pneg %p3091_p5 }
  0xa4   : > { %p3099_p13 = pnand %p3098_p6, %p3092_p8 }
  0xa6   : > { %3102 = shalt.err (!%p3099_p13)
}
  0xa7   : > { %2887 = dma.hbm_to_vmem [thread:$0]  (!%p3517_p9), %s4004_s10, 1024, %s601_s23, [#allocation18], %s3354_s1, %s3354_s1, %s3355_s17  }
  0xa8   : > { %s3358_s4 = smov [#allocation3]   ;;  %s3359_s14 = smov [#allocation7]  }
  0xa9   : > { %s483_s12 = sshll.u32 %s3358_s4, 4  ;;  %s509_s21 = sshll.u32 %s3359_s14, 4  ;;  %s484_s12 = int_to_ptr.vmem [resolvable:$true] %s483_s12  ;;  %s510_s21 = int_to_ptr.vmem [resolvable:$true] %s509_s21 }
  0xaa   : > { %s4052_s22 = sld [smem:[#allocation33_spill]] }
  0xb0   : > { %s3103_s11 = scalar_lea.hbm %s4052_s22, 512 }
  0xb1   : > { %p3104_p4 = scmp.ne.s32.totalorder %s4052_s22, %s3103_s11  ;;  %p3110_p1 = scmp.lt.u32.totalorder %s3103_s11, %s4052_s22 }
  0xb3   : > { %p3106_p7 = pnand %p3104_p4, %p3533_p11 }
  0xb5   : > { %p3107_p0 = pneg %p3106_p7 }
  0xb7   : > { %p3112_p2 = pnand %p3110_p1, %p3107_p0 }
  0xb9   : > { %3115 = shalt.err (!%p3112_p2)
}
  0xba   : > { %s3116_s23 = scalar_lea.vmem %s484_s12, 512  ;;  %p3124_p10 = scmp.lt.s32.totalorder %s484_s12, %s484_s12 }
  0xbb   : > { %p3117_p3 = scmp.ne.s32.totalorder %s484_s12, %s3116_s23  ;;  %p3125_p12 = scmp.lt.s32.totalorder %s3116_s23, %s3116_s23 }
  0xbd   : > { %p3119_p5 = pnand %p3117_p3, %p3533_p11  ;;  %p3126_p6 = por %p3125_p12, %p3124_p10 }
  0xbf   : > { %p3120_p8 = pneg %p3119_p5 }
  0xc1   : > { %p3127_p13 = pnand %p3126_p6, %p3120_p8 }
  0xc3   : > { %3130 = shalt.err (!%p3127_p13)
}
  0xc4   : > { %2860 = dma.hbm_to_vmem [thread:$0]  (!%p3517_p9), %s4052_s22, 512, %s484_s12, [#allocation4], %s3354_s1, %s3354_s1, %s3355_s17  }
  0xc5   : > { %s4053_s3 = sld [smem:[#allocation35_spill]] }
  0xcb   : > { %s3131_s28 = scalar_lea.hbm %s4053_s3, 512 }
  0xcc   : > { %p3132_p4 = scmp.ne.s32.totalorder %s4053_s3, %s3131_s28  ;;  %p3138_p1 = scmp.lt.u32.totalorder %s3131_s28, %s4053_s3 }
  0xce   : > { %p3134_p7 = pnand %p3132_p4, %p3533_p11 }
  0xd0   : > { %p3135_p0 = pneg %p3134_p7 }
  0xd2   : > { %p3140_p2 = pnand %p3138_p1, %p3135_p0 }
  0xd4   : > { %3143 = shalt.err (!%p3140_p2)
}
  0xd5   : > { %s3144_s23 = scalar_lea.vmem %s510_s21, 512  ;;  %p3152_p10 = scmp.lt.s32.totalorder %s510_s21, %s510_s21 }
  0xd6   : > { %p3145_p3 = scmp.ne.s32.totalorder %s510_s21, %s3144_s23  ;;  %p3153_p12 = scmp.lt.s32.totalorder %s3144_s23, %s3144_s23 }
  0xd8   : > { %p3147_p5 = pnand %p3145_p3, %p3533_p11  ;;  %p3154_p6 = por %p3153_p12, %p3152_p10 }
  0xda   : > { %p3148_p8 = pneg %p3147_p5 }
  0xdc   : > { %p3155_p13 = pnand %p3154_p6, %p3148_p8 }
  0xde   : > { %3158 = shalt.err (!%p3155_p13)
}
  0xdf   : > { %2866 = dma.hbm_to_vmem [thread:$0]  (!%p3517_p9), %s4053_s3, 512, %s510_s21, [#allocation6], %s3354_s1, %s3354_s1, %s3355_s17  }
  0xe0   : > { %s3360_s2 = smov [#allocation10]   ;;  %s3361_s14 = smov [#allocation13]  }
  0xe1   : > { %s535_s4 = sshll.u32 %s3360_s2, 4  ;;  %s561_s28 = sshll.u32 %s3361_s14, 4  ;;  %s536_s4 = int_to_ptr.vmem [resolvable:$true] %s535_s4  ;;  %s562_s28 = int_to_ptr.vmem [resolvable:$true] %s561_s28 }
  0xe2   : > { %s3159_s29 = scalar_lea.hbm %s3999_s5, 512 }
  0xe3   : > { %p3160_p4 = scmp.ne.s32.totalorder %s3999_s5, %s3159_s29  ;;  %p3166_p1 = scmp.lt.u32.totalorder %s3159_s29, %s3999_s5 }
  0xe5   : > { %p3162_p7 = pnand %p3160_p4, %p3533_p11 }
  0xe7   : > { %p3163_p0 = pneg %p3162_p7 }
  0xe9   : > { %p3168_p2 = pnand %p3166_p1, %p3163_p0 }
  0xeb   : > { %3171 = shalt.err (!%p3168_p2)
}
  0xec   : > { %s3172_s21 = scalar_lea.vmem %s536_s4, 512  ;;  %p3180_p10 = scmp.lt.s32.totalorder %s536_s4, %s536_s4 }
  0xed   : > { %p3173_p3 = scmp.ne.s32.totalorder %s536_s4, %s3172_s21  ;;  %p3181_p12 = scmp.lt.s32.totalorder %s3172_s21, %s3172_s21 }
  0xef   : > { %p3175_p5 = pnand %p3173_p3, %p3533_p11  ;;  %p3182_p6 = por %p3181_p12, %p3180_p10 }
  0xf1   : > { %p3176_p8 = pneg %p3175_p5 }
  0xf3   : > { %p3183_p13 = pnand %p3182_p6, %p3176_p8 }
  0xf5   : > { %3186 = shalt.err (!%p3183_p13)
}
  0xf6   : > { %2872 = dma.hbm_to_vmem [thread:$0]  (!%p3517_p9), %s3999_s5, 512, %s536_s4, [#allocation9], %s3354_s1, %s3354_s1, %s3355_s17  }
  0xf7   : > { %s3187_s11 = scalar_lea.hbm %s4001_s7, 1024 }
  0xf8   : > { %p3188_p4 = scmp.ne.s32.totalorder %s4001_s7, %s3187_s11  ;;  %p3194_p1 = scmp.lt.u32.totalorder %s3187_s11, %s4001_s7 }
  0xfa   : > { %p3190_p7 = pnand %p3188_p4, %p3533_p11 }
  0xfc   : > { %p3191_p0 = pneg %p3190_p7 }
  0xfe   : > { %p3196_p2 = pnand %p3194_p1, %p3191_p0 }
 0x100   : > { %3199 = shalt.err (!%p3196_p2)
}
 0x101   : > { %s3200_s12 = scalar_lea.vmem %s562_s28, 1024  ;;  %p3208_p10 = scmp.lt.s32.totalorder %s562_s28, %s562_s28 }
 0x102   : > { %p3201_p3 = scmp.ne.s32.totalorder %s562_s28, %s3200_s12  ;;  %p3209_p12 = scmp.lt.s32.totalorder %s3200_s12, %s3200_s12 }
 0x104   : > { %p3203_p5 = pnand %p3201_p3, %p3533_p11  ;;  %p3210_p6 = por %p3209_p12, %p3208_p10 }
 0x106   : > { %p3204_p8 = pneg %p3203_p5 }
 0x108   : > { %p3211_p13 = pnand %p3210_p6, %p3204_p8 }
 0x10a   : > { %3214 = shalt.err (!%p3211_p13)
}
 0x10b   : > { %2878 = dma.hbm_to_vmem [thread:$0]  (!%p3517_p9), %s4001_s7, 1024, %s562_s28, [#allocation12], %s3354_s1, %s3354_s1, %s3355_s17  }
 0x10c   : > { %s3362_s8 = smov [#allocation16]   ;;  %s3363_s2 = smov [#allocation19]  }
 0x10d   : > { %s587_s6 = sshll.u32 %s3362_s8, 4  ;;  %s619_s14 = sshll.u32 %s3363_s2, 4  ;;  %s588_s6 = int_to_ptr.vmem [resolvable:$true] %s587_s6  ;;  %s620_s14 = int_to_ptr.vmem [resolvable:$true] %s619_s14 }
 0x10e   : > { %s3215_s29 = scalar_lea.hbm %s4003_s9, 1024 }
 0x10f   : > { %p3216_p4 = scmp.ne.s32.totalorder %s4003_s9, %s3215_s29  ;;  %p3222_p1 = scmp.lt.u32.totalorder %s3215_s29, %s4003_s9 }
 0x111   : > { %p3218_p7 = pnand %p3216_p4, %p3533_p11 }
 0x113   : > { %p3219_p0 = pneg %p3218_p7 }
 0x115   : > { %p3224_p2 = pnand %p3222_p1, %p3219_p0 }
 0x117   : > { %3227 = shalt.err (!%p3224_p2)
}
 0x118   : > { %s3228_s28 = scalar_lea.vmem %s588_s6, 1024  ;;  %p3236_p10 = scmp.lt.s32.totalorder %s588_s6, %s588_s6 }
 0x119   : > { %p3229_p3 = scmp.ne.s32.totalorder %s588_s6, %s3228_s28  ;;  %p3237_p12 = scmp.lt.s32.totalorder %s3228_s28, %s3228_s28 }
 0x11b   : > { %p3231_p5 = pnand %p3229_p3, %p3533_p11  ;;  %p3238_p6 = por %p3237_p12, %p3236_p10 }
 0x11d   : > { %p3232_p8 = pneg %p3231_p5 }
 0x11f   : > { %p3239_p13 = pnand %p3238_p6, %p3232_p8 }
 0x121   : > { %3242 = shalt.err (!%p3239_p13)
}
 0x122   : > { %2884 = dma.hbm_to_vmem [thread:$0]  (!%p3517_p9), %s4003_s9, 1024, %s588_s6, [#allocation15], %s3354_s1, %s3354_s1, %s3355_s17  }
 0x123   : > { %s3243_s26 = scalar_lea.hbm %s4007_s13, 512 }
 0x124   : > { %p3244_p4 = scmp.ne.s32.totalorder %s4007_s13, %s3243_s26  ;;  %p3250_p1 = scmp.lt.u32.totalorder %s3243_s26, %s4007_s13 }
 0x126   : > { %p3246_p7 = pnand %p3244_p4, %p3533_p11 }
 0x128   : > { %p3247_p0 = pneg %p3246_p7 }
 0x12a   : > { %p3252_p2 = pnand %p3250_p1, %p3247_p0 }
 0x12c   : > { %3255 = shalt.err (!%p3252_p2)
}
 0x12d   : > { %s3256_s4 = scalar_lea.vmem %s620_s14, 512  ;;  %p3264_p10 = scmp.lt.s32.totalorder %s620_s14, %s620_s14 }
 0x12e   : > { %p3257_p3 = scmp.ne.s32.totalorder %s620_s14, %s3256_s4  ;;  %p3265_p12 = scmp.lt.s32.totalorder %s3256_s4, %s3256_s4 }
 0x130   : > { %p3259_p5 = pnand %p3257_p3, %p3533_p11  ;;  %p3266_p6 = por %p3265_p12, %p3264_p10 }
 0x132   : > { %p3260_p8 = pneg %p3259_p5 }
 0x134   : > { %p3267_p13 = pnand %p3266_p6, %p3260_p8 }
 0x136   : > { %3270 = shalt.err (!%p3267_p13)
}
 0x137   : > { %2890 = dma.hbm_to_vmem [thread:$0]  (!%p3517_p9), %s4007_s13, 512, %s620_s14, [#allocation18], %s3354_s1, %s3354_s1, %s3355_s17  }
 0x138   : > { %s3364_s21 = smov [#allocation20]   ;;  %s3271_s26 = scalar_lea.hbm %s4009_s15, 256 }
 0x139   : > { %s635_s8 = sshll.u32 %s3364_s21, 4  ;;  %p3272_p4 = scmp.ne.s32.totalorder %s4009_s15, %s3271_s26  ;;  %s636_s8 = int_to_ptr.vmem [resolvable:$true] %s635_s8 }
 0x13a   : > { %p3278_p1 = scmp.lt.u32.totalorder %s3271_s26, %s4009_s15 }
 0x13b   : > { %p3274_p7 = pnand %p3272_p4, %p3533_p11 }
 0x13d   : > { %p3275_p0 = pneg %p3274_p7 }
 0x13f   : > { %p3280_p2 = pnand %p3278_p1, %p3275_p0 }
 0x141   : > { %3283 = shalt.err (!%p3280_p2)
}
 0x142   : > { %s3284_s14 = scalar_lea.vmem %s636_s8, 256  ;;  %p3292_p10 = scmp.lt.s32.totalorder %s636_s8, %s636_s8 }
 0x143   : > { %p3285_p3 = scmp.ne.s32.totalorder %s636_s8, %s3284_s14  ;;  %p3293_p12 = scmp.lt.s32.totalorder %s3284_s14, %s3284_s14 }
 0x145   : > { %p3287_p5 = pnand %p3285_p3, %p3533_p11  ;;  %p3294_p6 = por %p3293_p12, %p3292_p10 }
 0x147   : > { %p3288_p8 = pneg %p3287_p5 }
 0x149   : > { %p3295_p13 = pnand %p3294_p6, %p3288_p8 }
 0x14b   : > { %3298 = shalt.err (!%p3295_p13)
}
 0x14c   : > { %2893 = dma.hbm_to_vmem [thread:$0]  (!%p3517_p9), %s4009_s15, 256, %s636_s8, [#allocation21], %s3354_s1, %s3354_s1, %s3355_s17  }
 0x14d   : > { %p2385_p4 = scmp.ge.s32.totalorder %s3349_s20, 2 }
 0x14e   : > { %p4054_p11 = scmp.ne.s32.totalorder (!%p2385_p4), %s4044_s24, 0 }
 0x14f   : > { %654 = sbr.rel (%p2385_p4) target bundleno = 353 (0x161), region = 88 }
 0x156   : > { %657 = sbr.rel (!%p4054_p11) target bundleno = 353 (0x161), region = 92  ;;  %s659_s18 = sand.u32 (%p4054_p11), 1, %s3345_s30  }
 0x157   : > { %s2387_s28 = sshll.u32 (%p4054_p11), %s3349_s20, 3  ;;  %s2386_s21 = sshll.u32 (%p4054_p11), %s659_s18, 4 }
 0x158   : > { %s4055_s11 = sld [smem:[#allocation32_spill]] (%p4054_p11)  ;;  %s661_s29 = scalar_lea.vmem (%p4054_p11), [#allocation2], %s2386_s21 }
 0x15e   : > { %s663_s26 = scalar_lea.vmem %s4055_s11, %s2387_s28 }
 0x15f   : > { %v693_v0 = vld [vmem:[%s663_s26] sm:$0xff]  ;;  %v695_v1 = vld [vmem:[%s663_s26 + $0x10] sm:$0xff] }
 0x160   : > { %694 = vst [vmem:[%s661_s29] sm:$0xff] %v693_v0  ;;  %696 = vst [vmem:[%s661_s29 + $0x8] sm:$0xff] %v695_v1 }
 0x161 PF: > { %p4056_p9 = scmp.ne.s32.totalorder %s4045_s25, 0 }
 0x162   : > { %s4057_s24 = sld [smem:[#allocation29_spill]] (!%p4056_p9)  ;;  %s708_s1 = sand.u32 (!%p4056_p9), 1, %s3341_s0  }
 0x163   : > { %705 = sbr.rel (%p4056_p9) target bundleno = 1775 (0x6ef), region = 130  ;;  %s2389_s17 = sshll.u32 (!%p4056_p9), %s708_s1, 4 }
 0x164   : > { %s710_s20 = scalar_lea.vmem (!%p4056_p9), [#allocation2], %s2389_s17 }
 0x168   : > { %p4058_p7 = scmp.eq.s32.totalorder (!%p4056_p9), %s4057_s24, 0 }
 0x16a   : > { %3312 = dma.done.wait (%p4058_p7), [#allocation4], 512   ;;  %p4059_p0 = pmov %p4058_p7 }
 0x16c   : > { %3314 = vsyncadd (%p4059_p0), [#allocation4], 4294966784  ;;  %p4060_p1 = pmov %p4059_p0 }
 0x16d   : > { %p4061_p2 = pmov %p4059_p0 }
 0x16e   : > { %3316 = dma.done.wait (%p4060_p1), [#allocation6], 1024  }
 0x16f   : > { %3318 = vsyncadd (%p4061_p2), [#allocation6], 4294966272  ;;  %p4062_p3 = pmov %p4059_p0 }
 0x170   : > { %p4063_p5 = pmov %p4059_p0 }
 0x171   : > { %3320 = dma.done.wait (%p4062_p3), [#allocation9], 1024  }
 0x172   : > { %3322 = vsyncadd (%p4063_p5), [#allocation9], 4294966272  ;;  %p4064_p8 = pmov %p4059_p0 }
 0x173   : > { %p4065_p10 = pmov %p4059_p0 }
 0x174   : > { %3324 = dma.done.wait (%p4064_p8), [#allocation12], 1536  }
 0x175   : > { %3326 = vsyncadd (%p4065_p10), [#allocation12], 4294965760  ;;  %p4066_p12 = pmov %p4059_p0 }
 0x176   : > { %p4067_p6 = pmov %p4059_p0 }
 0x177   : > { %3328 = dma.done.wait (%p4066_p12), [#allocation15], 2048  }
 0x178   : > { %3330 = vsyncadd (%p4067_p6), [#allocation15], 4294965248  ;;  %p4068_p13 = pmov %p4059_p0 }
 0x179   : > { %p4069_p4 = pmov %p4059_p0 }
 0x17a   : > { %3332 = dma.done.wait (%p4068_p13), [#allocation18], 1536  }
 0x17b   : > { %3334 = vsyncadd (%p4069_p4), [#allocation18], 4294965760  ;;  %p4070_p11 = pmov %p4059_p0 }
 0x17c   : > { %p4071_p9 = pmov %p4059_p0 }
 0x17d   : > { %3336 = dma.done.wait (%p4070_p11), [#allocation21], 256  }
 0x17e   : > { %3338 = vsyncadd (%p4071_p9), [#allocation21], 4294967040  ;;  %v3365_v2 = vmov 0   ;;  %vm857_vm0 = vcmask 1041408   ;;  %vm844_vm1 = vcmask 80896   ;;  %vm3366_vm2 = vmmov 1  }
 0x17f   : > { %2961 = vset.pattern.permute.xlu0 %v3365_v2  ;;  %2962 = vset.pattern.permute.xlu1 %v3365_v2  ;;  %vm3833_vm3 = vmpackc.low %vm857_vm0, %vm3366_vm2  ;;  %v814_v4 = vld [vmem:[%s710_s20] sm:$0xff]  ;;  %v815_v5 = vld [vmem:[%s710_s20 + $0x8] sm:$0x3]  ;;  %s4074_s8 = sld [smem:[#allocation40_spill]]  ;;  %s4075_s20 = sld [smem:[#allocation41_spill]]  ;;  %vm978_vm4 = vcmask 261120  }
 0x180   : > { %v816_v6 = vld [vmem:[#allocation3] sm:$0xff]  ;;  %v3837_v7 = vpack.c.bf16 %v815_v5, %v814_v4  ;;  %v817_v10 = vld [vmem:[#allocation3 + $0x8] sm:$0xff]  ;;  %v822_v12 = vld [vmem:[#allocation5 + $0x10] sm:$0xff]  ;;  %s4077_s28 = sld [smem:[#allocation42_spill]]  ;;  %s4078_s26 = sld [smem:[#allocation44_spill]]  ;;  %vm1684_vm5 = vcmask 523264  }
 0x181   : > { %2554 = vmatprep.mubr.msk.f32.mxu1 %vm844_vm1, %v816_v6  ;;  %v1080_v8 = vld [vmem:[#allocation10] sm:$0xff]  ;;  %v1081_v11 = vld [vmem:[#allocation10 + $0x8] sm:$0xff]  ;;  %v818_v13 = vld [vmem:[#allocation3 + $0x10] sm:$0xff]  ;;  %836 = vperm.xlu1 %2962, %v822_v12   ;;  %s4079_s17 = sld [smem:[#allocation39_spill]]  ;;  %vm3368_vm6 = vmmov 0   ;;  %vm2119_vm7 = vcmask 130048  }
 0x182   : > { %2578 = vmatprep.mubr.msk.f32.mxu0 %vm844_vm1, %v1080_v8  ;;  %2710 = vmatprep.subr.msk.bf16.mxu1 %vm3833_vm3, %v3837_v7  ;;  %v820_v9 = vld [vmem:[#allocation5] sm:$0xff]  ;;  %v1082_v14 = vld [vmem:[#allocation10 + $0x10] sm:$0xff]  ;;  %v821_v15 = vld [vmem:[#allocation5 + $0x8] sm:$0xff]  ;;  %p810_p7 = scmp.lt.s32.totalorder %s4057_s24, 1  ;;  %s4081_s12 = sld [smem:[#allocation45_spill]] }
 0x183   : > { %2724 = vmatprep.subr.msk.bf16.mxu0 %vm3833_vm3, %v3837_v7  ;;  %2713 = vmatpush3.bf16.msk.msra.mxu1 %vm3833_vm3, %v3837_v7  ;;  %v823_v16 = vld [vmem:[#allocation5 + $0x18] sm:$0xff]  ;;  %v1084_v19 = vld [vmem:[#allocation11] sm:$0xff]  ;;  %v1085_v20 = vld [vmem:[#allocation11 + $0x8] sm:$0xff] }
 0x184   : > { %2727 = vmatpush3.bf16.msk.msra.mxu0 %vm3833_vm3, %v3837_v7  ;;  %826 = vperm.xlu0 %2961, %v820_v9   ;;  %v819_v17 = vld [vmem:[#allocation3 + $0x18] sm:$0xff]  ;;  %v1086_v21 = vld [vmem:[#allocation11 + $0x10] sm:$0xff]  ;;  %v954_v23 = vld [vmem:[#allocation8] sm:$0xff]  ;;  %s4087_s24 = smov (!%p810_p7, %s4057_s24), 1 }
 0x185   : > { %v1083_v18 = vld [vmem:[#allocation10 + $0x18] sm:$0xff]  ;;  %841 = vperm.xlu1 %2962, %v823_v16   ;;  %v955_v24 = vld [vmem:[#allocation8 + $0x8] sm:$0xff]  ;;  %v956_v25 = vld [vmem:[#allocation8 + $0x10] sm:$0xff]  ;;  %s4076_s25 = smov %s4075_s20  ;;  %s2402_s0 = sshll.u32 %s4087_s24, 3 }
 0x186   : > { %2555 = vmatmul.mubr.msk.f32.vlgmr.msra.gmra.mrb[0].mxu1 %vm844_vm1, %v817_v10  ;;  %v1087_v22 = vld [vmem:[#allocation11 + $0x18] sm:$0xff]  ;;  %v1217_v27 = vld [vmem:[#allocation14] sm:$0xff]  ;;  %v1218_v28 = vld [vmem:[#allocation14 + $0x8] sm:$0xff] }
 0x187   : > { %2579 = vmatmul.mubr.msk.f32.vlgmr.msra.gmra.mrb[0].mxu0 %vm844_vm1, %v1081_v11  ;;  %2557 = vmatprep.mubr.msk.f32.mxu1 %vm844_vm1, %v818_v13  ;;  %v957_v26 = vld [vmem:[#allocation8 + $0x18] sm:$0xff]  ;;  %v1219_v29 = vld [vmem:[#allocation14 + $0x10] sm:$0xff]  ;;  %v1221_v31 = vld [vmem:[#allocation14 + $0x20] sm:$0xff] }
 0x188   : > { %2581 = vmatprep.mubr.msk.f32.mxu0 %vm844_vm1, %v1082_v14  ;;  %831 = vperm.xlu0 %2961, %v821_v15   ;;  %v1220_v30 = vld [vmem:[#allocation14 + $0x18] sm:$0xff]  ;;  %v1222_v32 = vld [vmem:[#allocation14 + $0x28] sm:$0xff]  ;;  %v1223_v33 = vld [vmem:[#allocation14 + $0x30] sm:$0xff]  ;;  %s813_s14 = scalar_lea.vmem %s4081_s12, %s2402_s0 }
 0x189   : > { %1095 = vperm.xlu1 %2962, %v1085_v20   ;;  %v1224_v34 = vld [vmem:[#allocation14 + $0x38] sm:$0xff]  ;;  %v1822_v35 = vld [vmem:[%s4074_s8] sm:$0xff]  ;;  %v1823_v36 = vld [vmem:[%s4074_s8 + $0x8] sm:$0xff] }
 0x18a   : > { %2558 = vmatmul.mubr.msk.f32.gmra.mrb[2].mxu1 %vm844_vm1, %v819_v17  ;;  %v1824_v37 = vld [vmem:[%s4074_s8 + $0x10] sm:$0xff]  ;;  %v1825_v38 = vld [vmem:[%s4074_s8 + $0x18] sm:$0xff]  ;;  %v1826_v39 = vld [vmem:[%s4074_s8 + $0x20] sm:$0xff] }
 0x18b   : > { %2582 = vmatmul.mubr.msk.f32.gmra.mrb[2].mxu0 %vm844_vm1, %v1083_v18  ;;  %v1827_v40 = vld [vmem:[%s4074_s8 + $0x28] sm:$0xff]  ;;  %v1828_v41 = vld [vmem:[%s4074_s8 + $0x30] sm:$0xff]  ;;  %v1829_v42 = vld [vmem:[%s4074_s8 + $0x38] sm:$0xff] }
 0x18c   : > { %1090 = vperm.xlu0 %2961, %v1084_v19   ;;  %v1890_v43 = vld [vmem:[%s4075_s20] sm:$0xff]  ;;  %v1891_v44 = vld [vmem:[%s4076_s25 + $0x8] sm:$0xff]  ;;  %v1892_v45 = vld [vmem:[%s4076_s25 + $0x10] sm:$0xff]  ;;  %s4080_s20 = sld [smem:[#allocation43_spill]] }
 0x18d   : > { %1105 = vperm.xlu1 %2962, %v1087_v22   ;;  %v1893_v46 = vld [vmem:[%s4076_s25 + $0x18] sm:$0xff]  ;;  %v2017_v47 = vld [vmem:[%s4077_s28] sm:$0xff]  ;;  %v2018_v48 = vld [vmem:[%s4077_s28 + $0x8] sm:$0xff] }
 0x18e   : > { %v2113_v49 = vld [vmem:[%s4078_s26] sm:$0xff]  ;;  %v1415_v3 = vld [vmem:[#allocation17 + $0x28] sm:$0xff] }
 0x18f   : > { %v950_v50 = vld [vmem:[#allocation7] sm:$0xff] }
 0x190   : > { %1100 = vperm.xlu0 %2961, %v1086_v21   ;;  %2568 = vmatprep.mubr.msk.f32.mxu1 %vm978_vm4, %v950_v50 }
 0x191   : > { %965 = vperm.xlu1 %2962, %v955_v24  }
 0x194   : > { %960 = vperm.xlu0 %2961, %v954_v23  }
 0x195   : > { %975 = vperm.xlu1 %2962, %v957_v26   ;;  %v952_v26 = vld [vmem:[#allocation7 + $0x10] sm:$0xff] }
 0x198   : > { %970 = vperm.xlu0 %2961, %v956_v25   ;;  %v951_v25 = vld [vmem:[#allocation7 + $0x8] sm:$0xff] }
 0x199   : > { %1232 = vperm.xlu1 %2962, %v1218_v28   ;;  %v1209_v28 = vld [vmem:[#allocation13] sm:$0xff] }
 0x19c   : > { %1227 = vperm.xlu0 %2961, %v1217_v27   ;;  %v953_v27 = vld [vmem:[#allocation7 + $0x18] sm:$0xff] }
 0x19d   : > { %1242 = vperm.xlu1 %2962, %v1220_v30   ;;  %v1211_v30 = vld [vmem:[#allocation13 + $0x10] sm:$0xff] }
 0x1a0   : > { %1237 = vperm.xlu0 %2961, %v1219_v29   ;;  %v1210_v29 = vld [vmem:[#allocation13 + $0x8] sm:$0xff] }
 0x1a1   : > { %1252 = vperm.xlu1 %2962, %v1222_v32   ;;  %v1213_v32 = vld [vmem:[#allocation13 + $0x20] sm:$0xff] }
 0x1a4   : > { %1247 = vperm.xlu0 %2961, %v1221_v31   ;;  %v1212_v31 = vld [vmem:[#allocation13 + $0x18] sm:$0xff] }
 0x1a5   : > { %1262 = vperm.xlu1 %2962, %v1224_v34   ;;  %v1215_v34 = vld [vmem:[#allocation13 + $0x30] sm:$0xff] }
 0x1a8   : > { %1257 = vperm.xlu0 %2961, %v1223_v33   ;;  %v1214_v33 = vld [vmem:[#allocation13 + $0x28] sm:$0xff] }
 0x1a9   : > { %1837 = vperm.xlu1 %2962, %v1823_v36   ;;  %v1410_v36 = vld [vmem:[#allocation17] sm:$0xff] }
 0x1aa   : > { %2612 = vmatprep.mubr.msk.f32.mxu0 %vm978_vm4, %v1410_v36  ;;  %v1404_v36 = vld [vmem:[#allocation16 + $0x10] sm:$0xff] }
 0x1ac   : > { %1832 = vperm.xlu0 %2961, %v1822_v35   ;;  %v1216_v35 = vld [vmem:[#allocation13 + $0x38] sm:$0xff] }
 0x1ad   : > { %1847 = vperm.xlu1 %2962, %v1825_v38  }
 0x1b0   : > { %1842 = vperm.xlu0 %2961, %v1824_v37  }
 0x1b1   : > { %1857 = vperm.xlu1 %2962, %v1827_v40  }
 0x1b4   : > { %1852 = vperm.xlu0 %2961, %v1826_v39  }
 0x1b5   : > { %1867 = vperm.xlu1 %2962, %v1829_v42  }
 0x1b8   : > { %1862 = vperm.xlu0 %2961, %v1828_v41  }
 0x1b9   : > { %1901 = vperm.xlu1 %2962, %v1891_v44  }
 0x1bc   : > { %1896 = vperm.xlu0 %2961, %v1890_v43  }
 0x1bd   : > { %1911 = vperm.xlu1 %2962, %v1893_v46  }
 0x1c0   : > { %1906 = vperm.xlu0 %2961, %v1892_v45  }
 0x1c1   : > { %2026 = vperm.xlu1 %2962, %v2018_v48  }
 0x1c4   : > { %2021 = vperm.xlu0 %2961, %v2017_v47  }
 0x1c8   : > { %2116 = vperm.xlu0 %2961, %v2113_v49  }
 0x200   : > { %v837_v52 = vpop.permute.xlu1 %836 }
 0x203   : > { %v827_v51 = vpop.permute.xlu0 %826 }
 0x204   : > { %v842_v54 = vpop.permute.xlu1 %841 }
 0x207   : > { %v832_v53 = vpop.permute.xlu0 %831 }
 0x208   : > { %v1096_v56 = vpop.permute.xlu1 %1095 }
 0x20b   : > { %v1091_v55 = vpop.permute.xlu0 %1090 }
 0x20c   : > { %v1106_v2 = vpop.permute.xlu1 %1105 }
 0x20f   : > { %v1101_v1 = vpop.permute.xlu0 %1100 }
 0x210   : > { %v966_v37 = vpop.permute.xlu1 %965 }
 0x213   : > { %v961_v38 = vpop.permute.xlu0 %960 }
 0x214   : > { %v976_v39 = vpop.permute.xlu1 %975 }
 0x217   : > { %v971_v40 = vpop.permute.xlu0 %970 }
 0x218   : > { %v1233_v44 = vpop.permute.xlu1 %1232 }
 0x21b   : > { %v1228_v46 = vpop.permute.xlu0 %1227 }
 0x259   : > { %v2556_v57 = vpop.f32.mrb[0].mxu1 }
 0x25a   : > { %v2580_v58 = vpop.f32.mrb[0].mxu0  ;;  %v933_v59 = vadd.f32 %v2556_v57, %v832_v53  ;;  %v927_v61 = vpop.f32.mrb[1].mxu1 }
 0x25b   : > { %v1192_v60 = vadd.f32 %v2580_v58, %v1096_v56  ;;  %v1186_v62 = vpop.f32.mrb[1].mxu0  ;;  %v928_v63 = vadd.f32 %v927_v61, %v827_v51  ;;  %v1238_v58 = vpop.permute.xlu0 %1237 }
 0x25c   : > { %v1187_v0 = vadd.f32 %v1186_v62, %v1091_v55  ;;  %v947_v4 = vmax.f32 %v933_v59, 0.0  ;;  %v1243_v55 = vpop.permute.xlu1 %1242 }
 0x25d   : > { %v1206_v5 = vmax.f32 %v1192_v60, 0.0  ;;  %v946_v6 = vmax.f32 %v928_v63, 0.0  ;;  %v2559_v9 = vpop.f32.mrb[2].mxu1 }
 0x25e   : > { %v1205_v8 = vmax.f32 %v1187_v0, 0.0  ;;  %v2583_v10 = vpop.f32.mrb[2].mxu0  ;;  %v943_v11 = vadd.f32 %v2559_v9, %v842_v54  ;;  %v937_v13 = vpop.f32.mrb[3].mxu1 }
 0x25f   : > { %v1202_v12 = vadd.f32 %v2583_v10, %v1106_v2  ;;  %v1196_v14 = vpop.f32.mrb[3].mxu0  ;;  %v2714_v15 = vpack.c.bf16 %v947_v4, %v946_v6  ;;  %v938_v17 = vadd.f32 %v937_v13, %v837_v52  ;;  %v1412_v10 = vld [vmem:[#allocation17 + $0x10] sm:$0xff] }
 0x260   : > { %v2728_v16 = vpack.c.bf16 %v1206_v5, %v1205_v8  ;;  %v1197_v18 = vadd.f32 %v1196_v14, %v1101_v1  ;;  %v949_v19 = vmax.f32 %v943_v11, 0.0  ;;  %v1411_v5 = vld [vmem:[#allocation17 + $0x8] sm:$0xff]  ;;  %v1253_v6 = vpop.permute.xlu1 %1252  ;;  %v1248_v11 = vpop.permute.xlu0 %1247 }
 0x261   : > { %v1208_v20 = vmax.f32 %v1202_v12, 0.0  ;;  %v948_v21 = vmax.f32 %v938_v17, 0.0  ;;  %2715 = vmatprep.subr.bf16.mxu1 %v2714_v15  ;;  %v1413_v17 = vld [vmem:[#allocation17 + $0x18] sm:$0xff] }
 0x262   : > { %v1207_v22 = vmax.f32 %v1197_v18, 0.0  ;;  %2717 = vmatpush3.bf16.msra.mxu1 %v2714_v15 }
 0x263   : > { %v2718_v23 = vpack.c.bf16 %v949_v19, %v948_v21 }
 0x264   : > { %v2732_v24 = vpack.c.bf16 %v1208_v20, %v1207_v22  ;;  %v1414_v20 = vld [vmem:[#allocation17 + $0x20] sm:$0xff]  ;;  %v1263_v22 = vpop.permute.xlu1 %1262 }
 0x265   : > { %2719 = vmatprep.subr.bf16.mxu1 %v2718_v23 }
 0x266   : > { %2721 = vmatpush3.bf16.msra.mxu1 %v2718_v23 }
 0x267   : > { %2729 = vmatprep.subr.bf16.mxu1 %v2728_v16 }
 0x269   : > { %2569 = vmatmul.mubr.msk.f32.vlgmr.msra.gmra.mrb[4].mxu1 %vm978_vm4, %v951_v25  ;;  %v1258_v25 = vpop.permute.xlu0 %1257 }
 0x26a   : > { %2731 = vmatpush3.bf16.msra.mxu1 %v2728_v16  ;;  %2571 = vmatprep.mubr.msk.f32.mxu1 %vm978_vm4, %v952_v26 }
 0x26b   : > { %2733 = vmatprep.subr.bf16.mxu1 %v2732_v24 }
 0x26d   : > { %2572 = vmatmul.mubr.msk.f32.gmra.mrb[6].mxu1 %vm978_vm4, %v953_v27 }
 0x26e   : > { %2735 = vmatpush3.bf16.msra.mxu1 %v2732_v24  ;;  %2592 = vmatprep.mubr.msk.f32.mxu1 %vm978_vm4, %v1209_v28 }
 0x271   : > { %2593 = vmatmul.mubr.msk.f32.vlgmr.msra.gmra.mrb[8].mxu1 %vm978_vm4, %v1210_v29  ;;  %v1416_v29 = vld [vmem:[#allocation17 + $0x30] sm:$0xff] }
 0x272   : > { %2595 = vmatprep.mubr.msk.f32.mxu1 %vm978_vm4, %v1211_v30 }
 0x275   : > { %2596 = vmatmul.mubr.msk.f32.gmra.mrb[10].mxu1 %vm978_vm4, %v1212_v31 }
 0x276   : > { %2598 = vmatprep.mubr.msk.f32.mxu1 %vm978_vm4, %v1213_v32  ;;  %v1417_v32 = vld [vmem:[#allocation17 + $0x38] sm:$0xff] }
 0x279   : > { %2599 = vmatmul.mubr.msk.f32.gmra.mrb[12].mxu1 %vm978_vm4, %v1214_v33 }
 0x27a   : > { %2601 = vmatprep.mubr.msk.f32.mxu1 %vm978_vm4, %v1215_v34  ;;  %v1402_v34 = vld [vmem:[#allocation16] sm:$0xff] }
 0x27d   : > { %2602 = vmatmul.mubr.msk.f32.gmra.mrb[14].mxu1 %vm978_vm4, %v1216_v35  ;;  %v1403_v35 = vld [vmem:[#allocation16 + $0x8] sm:$0xff] }
 0x33c   : > { %v2570_v41 = vpop.f32.mrb[4].mxu1 }
 0x33d   : > { %v1063_v42 = vadd.f32 %v2570_v41, %v966_v37  ;;  %v1057_v43 = vpop.f32.mrb[5].mxu1  ;;  %v1405_v37 = vld [vmem:[#allocation16 + $0x18] sm:$0xff] }
 0x33e   : > { %v1058_v45 = vadd.f32 %v1057_v43, %v961_v38  ;;  %v1406_v38 = vld [vmem:[#allocation16 + $0x20] sm:$0xff]  ;;  %v1409_v41 = vld [vmem:[#allocation16 + $0x38] sm:$0xff]  ;;  %v1677_v43 = vld [vmem:[%s4079_s17 + $0x8] sm:$0xff] }
 0x33f   : > { %v1077_v47 = vmax.f32 %v1063_v42, 0.0  ;;  %v1676_v42 = vld [vmem:[%s4079_s17] sm:$0xff] }
 0x340   : > { %v1076_v48 = vmax.f32 %v1058_v45, 0.0  ;;  %v2573_v49 = vpop.f32.mrb[6].mxu1  ;;  %v1679_v45 = vld [vmem:[%s4079_s17 + $0x18] sm:$0xff] }
 0x341   : > { %v1073_v50 = vadd.f32 %v2573_v49, %v976_v39  ;;  %v1067_v51 = vpop.f32.mrb[7].mxu1  ;;  %v1407_v39 = vld [vmem:[#allocation16 + $0x28] sm:$0xff]  ;;  %v1683_v49 = vld [vmem:[%s4079_s17 + $0x38] sm:$0xff] }
 0x342   : > { %v2736_v52 = vpack.c.bf16 %v1077_v47, %v1076_v48  ;;  %v1068_v53 = vadd.f32 %v1067_v51, %v971_v40  ;;  %v1408_v40 = vld [vmem:[#allocation16 + $0x30] sm:$0xff]  ;;  %v1681_v47 = vld [vmem:[%s4079_s17 + $0x28] sm:$0xff]  ;;  %v1838_v51 = vpop.permute.xlu1 %1837 }
 0x343   : > { %v1079_v54 = vmax.f32 %v1073_v50, 0.0  ;;  %v1682_v48 = vld [vmem:[%s4079_s17 + $0x30] sm:$0xff]  ;;  %v1886_v50 = vld [vmem:[#allocation19] sm:$0xff] }
 0x344   : > { %v1078_v56 = vmax.f32 %v1068_v53, 0.0  ;;  %v2594_v57 = vpop.f32.mrb[8].mxu1  ;;  %2737 = vmatprep.subr.bf16.mxu0 %v2736_v52  ;;  %2684 = vmatprep.mubr.msk.f32.mxu1 %vm1684_vm5, %v1886_v50 }
 0x345   : > { %v1361_v59 = vadd.f32 %v2594_v57, %v1233_v44  ;;  %v1355_v60 = vpop.f32.mrb[9].mxu1  ;;  %2739 = vmatpush3.bf16.msra.mxu0 %v2736_v52  ;;  %v1678_v44 = vld [vmem:[%s4079_s17 + $0x10] sm:$0xff]  ;;  %v1833_v52 = vpop.permute.xlu0 %1832 }
 0x346   : > { %v2740_v61 = vpack.c.bf16 %v1079_v54, %v1078_v56  ;;  %v1356_v62 = vadd.f32 %v1355_v60, %v1228_v46  ;;  %v1680_v46 = vld [vmem:[%s4079_s17 + $0x20] sm:$0xff]  ;;  %v1848_v53 = vpop.permute.xlu1 %1847 }
 0x347   : > { %v1395_v63 = vmax.f32 %v1361_v59, 0.0 }
 0x348   : > { %v1394_v0 = vmax.f32 %v1356_v62, 0.0  ;;  %v2597_v1 = vpop.f32.mrb[10].mxu1  ;;  %2741 = vmatprep.subr.bf16.mxu0 %v2740_v61 }
 0x349   : > { %v1371_v2 = vadd.f32 %v2597_v1, %v1243_v55  ;;  %v1365_v4 = vpop.f32.mrb[11].mxu1  ;;  %2743 = vmatpush3.bf16.msra.mxu0 %v2740_v61  ;;  %v1843_v55 = vpop.permute.xlu0 %1842 }
 0x34a   : > { %v2750_v8 = vpack.c.bf16 %v1395_v63, %v1394_v0  ;;  %v1366_v9 = vadd.f32 %v1365_v4, %v1238_v58  ;;  %2746 = vmatprep.subr.msk.bf16.mxu0 %vm3833_vm3, %v3837_v7  ;;  %v1858_v0 = vpop.permute.xlu1 %1857 }
 0x34b   : > { %v1397_v12 = vmax.f32 %v1371_v2, 0.0 }
 0x34c   : > { %v1396_v13 = vmax.f32 %v1366_v9, 0.0  ;;  %v2600_v14 = vpop.f32.mrb[12].mxu1  ;;  %2613 = vmatmul.mubr.msk.f32.vlgmr.msra.gmra.mrb[4].mxu0 %vm978_vm4, %v1411_v5 }
 0x34d   : > { %v1381_v15 = vadd.f32 %v2600_v14, %v1253_v6  ;;  %v1375_v16 = vpop.f32.mrb[13].mxu1  ;;  %2749 = vmatpush3.bf16.msk.msra.mxu0 %vm3833_vm3, %v3837_v7  ;;  %2615 = vmatprep.mubr.msk.f32.mxu0 %vm978_vm4, %v1412_v10  ;;  %v1853_v4 = vpop.permute.xlu0 %1852 }
 0x34e   : > { %v2754_v18 = vpack.c.bf16 %v1397_v12, %v1396_v13  ;;  %v1376_v19 = vadd.f32 %v1375_v16, %v1248_v11  ;;  %2751 = vmatprep.subr.bf16.mxu0 %v2750_v8  ;;  %v1868_v14 = vpop.permute.xlu1 %1867 }
 0x34f   : > { %v1399_v21 = vmax.f32 %v1381_v15, 0.0 }
 0x350   : > { %v1398_v23 = vmax.f32 %v1376_v19, 0.0  ;;  %v2603_v24 = vpop.f32.mrb[14].mxu1  ;;  %2616 = vmatmul.mubr.msk.f32.gmra.mrb[6].mxu0 %vm978_vm4, %v1413_v17 }
 0x351   : > { %v1391_v26 = vadd.f32 %v2603_v24, %v1263_v22  ;;  %v1385_v27 = vpop.f32.mrb[15].mxu1  ;;  %2618 = vmatprep.mubr.msk.f32.mxu0 %vm978_vm4, %v1414_v20  ;;  %v1863_v17 = vpop.permute.xlu0 %1862 }
 0x352   : > { %v2758_v7 = vpack.c.bf16 %v1399_v21, %v1398_v23  ;;  %v1386_v28 = vadd.f32 %v1385_v27, %v1258_v25  ;;  %v1887_v25 = vld [vmem:[#allocation19 + $0x8] sm:$0xff]  ;;  %v1889_v27 = vld [vmem:[#allocation19 + $0x18] sm:$0xff] }
 0x353   : > { %v1401_v30 = vmax.f32 %v1391_v26, 0.0  ;;  %v1888_v26 = vld [vmem:[#allocation19 + $0x10] sm:$0xff] }
 0x354   : > { %v1400_v31 = vmax.f32 %v1386_v28, 0.0  ;;  %2619 = vmatmul.mubr.msk.f32.gmra.mrb[8].mxu0 %vm978_vm4, %v1415_v3  ;;  %v2015_v3 = vld [vmem:[#allocation20] sm:$0xff] }
 0x355   : > { %2621 = vmatprep.mubr.msk.f32.mxu0 %vm978_vm4, %v1416_v29  ;;  %v1897_v28 = vpop.permute.xlu0 %1896 }
 0x356   : > { %v2762_v33 = vpack.c.bf16 %v1401_v30, %v1400_v31 }
 0x358   : > { %2622 = vmatmul.mubr.msk.f32.gmra.mrb[10].mxu0 %vm978_vm4, %v1417_v32 }
 0x359   : > { %2628 = vmatprep.mubr.msk.f32.mxu0 %vm844_vm1, %v1402_v34 }
 0x35c   : > { %2629 = vmatmul.mubr.msk.f32.vlgmr.msra.gmra.mrb[4].mxu0 %vm844_vm1, %v1403_v35 }
 0x35d   : > { %2753 = vmatpush3.bf16.msra.mxu0 %v2750_v8  ;;  %2631 = vmatprep.mubr.msk.f32.mxu0 %vm844_vm1, %v1404_v36 }
 0x35e   : > { %2755 = vmatprep.subr.bf16.mxu0 %v2754_v18 }
 0x360   : > { %2632 = vmatmul.mubr.msk.f32.gmra.mrb[6].mxu0 %vm844_vm1, %v1405_v37  ;;  %v1907_v37 = vpop.permute.xlu0 %1906 }
 0x361   : > { %2757 = vmatpush3.bf16.msra.mxu0 %v2754_v18  ;;  %2634 = vmatprep.mubr.msk.f32.mxu0 %vm844_vm1, %v1406_v38 }
 0x362   : > { %2759 = vmatprep.subr.bf16.mxu0 %v2758_v7 }
 0x364   : > { %2635 = vmatmul.mubr.msk.f32.gmra.mrb[8].mxu0 %vm844_vm1, %v1407_v39  ;;  %v2022_v50 = vpop.permute.xlu0 %2021 }
 0x365   : > { %2761 = vmatpush3.bf16.msra.mxu0 %v2758_v7  ;;  %2637 = vmatprep.mubr.msk.f32.mxu0 %vm844_vm1, %v1408_v40  ;;  %v1902_v7 = vpop.permute.xlu1 %1901 }
 0x366   : > { %2763 = vmatprep.subr.bf16.mxu0 %v2762_v33 }
 0x368   : > { %2638 = vmatmul.mubr.msk.f32.gmra.mrb[10].mxu0 %vm844_vm1, %v1409_v41 }
 0x369   : > { %2765 = vmatpush3.bf16.msra.mxu0 %v2762_v33  ;;  %2656 = vmatprep.mubr.msk.f32.mxu0 %vm1684_vm5, %v1676_v42  ;;  %v1912_v34 = vpop.permute.xlu1 %1911 }
 0x36c   : > { %2657 = vmatmul.mubr.msk.f32.vlgmr.msra.gmra.mrb[4].mxu0 %vm1684_vm5, %v1677_v43 }
 0x36d   : > { %2659 = vmatprep.mubr.msk.f32.mxu0 %vm1684_vm5, %v1678_v44 }
 0x370   : > { %2660 = vmatmul.mubr.msk.f32.gmra.mrb[6].mxu0 %vm1684_vm5, %v1679_v45  ;;  %v2016_v45 = vld [vmem:[#allocation20 + $0x8] sm:$0xff] }
 0x371   : > { %2662 = vmatprep.mubr.msk.f32.mxu0 %vm1684_vm5, %v1680_v46  ;;  %v3367_v46 = vmov 0.0|0.0  }
 0x374   : > { %2663 = vmatmul.mubr.msk.f32.gmra.mrb[8].mxu0 %vm1684_vm5, %v1681_v47  ;;  %v3369_v47 = vmov 0.0  }
 0x375   : > { %2665 = vmatprep.mubr.msk.f32.mxu0 %vm1684_vm5, %v1682_v48  ;;  %v2027_v48 = vpop.permute.xlu1 %2026 }
 0x378   : > { %2666 = vmatmul.mubr.msk.f32.gmra.mrb[10].mxu0 %vm1684_vm5, %v1683_v49 }
 0x43f   : > { %v2658_v54 = vpop.f32.mrb[4].mxu0 }
 0x440   : > { %v1871_v56 = vadd.f32 %v2658_v54, %v1838_v51  ;;  %v1775_v57 = vpop.f32.mrb[5].mxu0 }
 0x441   : > { %v1870_v58 = vadd.f32 %v1833_v52, %v1775_v57  ;;  %v2112_v57 = vld [vmem:[%s4080_s20] sm:$0xff] }
 0x442   : > { %v1879_v59 = vmax.f32 %v1871_v56, 0.0 }
 0x443   : > { %v1878_v60 = vmax.f32 %v1870_v58, 0.0  ;;  %v2661_v61 = vpop.f32.mrb[6].mxu0  ;;  %v2117_v58 = vpop.permute.xlu0 %2116 }
 0x444   : > { %v1873_v62 = vadd.f32 %v2661_v61, %v1848_v53  ;;  %v1785_v63 = vpop.f32.mrb[7].mxu0 }
 0x445   : > { %v2766_v1 = vpack.c.bf16 %v1879_v59, %v1878_v60  ;;  %v1872_v2 = vadd.f32 %v1843_v55, %v1785_v63 }
 0x446   : > { %v1881_v5 = vmax.f32 %v1873_v62, 0.0 }
 0x447   : > { %v1880_v6 = vmax.f32 %v1872_v2, 0.0  ;;  %v2664_v8 = vpop.f32.mrb[8].mxu0  ;;  %2767 = vmatprep.subr.bf16.mxu1 %v2766_v1 }
 0x448   : > { %v1875_v9 = vadd.f32 %v2664_v8, %v1858_v0  ;;  %v1795_v10 = vpop.f32.mrb[9].mxu0  ;;  %2769 = vmatpush3.bf16.msra.mxu1 %v2766_v1 }
 0x449   : > { %v2770_v11 = vpack.c.bf16 %v1881_v5, %v1880_v6  ;;  %v1874_v12 = vadd.f32 %v1853_v4, %v1795_v10 }
 0x44a   : > { %v1883_v13 = vmax.f32 %v1875_v9, 0.0 }
 0x44b   : > { %v1882_v15 = vmax.f32 %v1874_v12, 0.0  ;;  %v2667_v16 = vpop.f32.mrb[10].mxu0  ;;  %2771 = vmatprep.subr.bf16.mxu1 %v2770_v11 }
 0x44c   : > { %v1877_v18 = vadd.f32 %v2667_v16, %v1868_v14  ;;  %v1805_v19 = vpop.f32.mrb[11].mxu0  ;;  %2773 = vmatpush3.bf16.msra.mxu1 %v2770_v11 }
 0x44d   : > { %v2774_v20 = vpack.c.bf16 %v1883_v13, %v1882_v15  ;;  %v1876_v21 = vadd.f32 %v1863_v17, %v1805_v19 }
 0x44e   : > { %v1885_v22 = vmax.f32 %v1877_v18, 0.0 }
 0x44f   : > { %v1884_v23 = vmax.f32 %v1876_v21, 0.0  ;;  %2775 = vmatprep.subr.bf16.mxu1 %v2774_v20 }
 0x450   : > { %2777 = vmatpush3.bf16.msra.mxu1 %v2774_v20 }
 0x451   : > { %v2778_v24 = vpack.c.bf16 %v1885_v22, %v1884_v23 }
 0x453   : > { %2779 = vmatprep.subr.bf16.mxu1 %v2778_v24 }
 0x454   : > { %2781 = vmatpush3.bf16.msra.mxu1 %v2778_v24 }
 0x457   : > { %2685 = vmatmul.mubr.msk.f32.vlgmr.msra.gmra.mrb[16].mxu1 %vm1684_vm5, %v1887_v25 }
 0x458   : > { %2687 = vmatprep.mubr.msk.f32.mxu1 %vm1684_vm5, %v1888_v26 }
 0x45b   : > { %2688 = vmatmul.mubr.msk.f32.gmra.mrb[18].mxu1 %vm1684_vm5, %v1889_v27 }
 0x45c   : > { %2698 = vmatprep.mubr.msk.f32.mxu1 %vm978_vm4, %v2015_v3 }
 0x52a   : > { %v2686_v29 = vpop.f32.mrb[16].mxu1 }
 0x52b   : > { %v1998_v30 = vadd.f32 %v2686_v29, %v1902_v7  ;;  %v1992_v31 = vpop.f32.mrb[17].mxu1 }
 0x52c   : > { %v1993_v32 = vadd.f32 %v1992_v31, %v1897_v28 }
 0x52d   : > { %v2012_v33 = vmax.f32 %v1998_v30, 0.0 }
 0x52e   : > { %v2011_v35 = vmax.f32 %v1993_v32, 0.0  ;;  %v2689_v36 = vpop.f32.mrb[18].mxu1 }
 0x52f   : > { %v2008_v38 = vadd.f32 %v2689_v36, %v1912_v34  ;;  %v2002_v39 = vpop.f32.mrb[19].mxu1 }
 0x530   : > { %v2782_v40 = vpack.c.bf16 %v2012_v33, %v2011_v35  ;;  %v2003_v41 = vadd.f32 %v2002_v39, %v1907_v37 }
 0x531   : > { %v2014_v42 = vmax.f32 %v2008_v38, 0.0 }
 0x532   : > { %v2013_v43 = vmax.f32 %v2003_v41, 0.0  ;;  %2783 = vmatprep.subr.bf16.mxu1 %v2782_v40 }
 0x533   : > { %2785 = vmatpush3.bf16.msra.mxu1 %v2782_v40 }
 0x534   : > { %v2786_v44 = vpack.c.bf16 %v2014_v42, %v2013_v43 }
 0x536   : > { %2787 = vmatprep.subr.bf16.mxu1 %v2786_v44 }
 0x537   : > { %2789 = vmatpush3.bf16.msra.mxu1 %v2786_v44 }
 0x538   : > { %2790 = vmatprep.subr.bf16.mxu1 %v3367_v46 }
 0x53a   : > { %2699 = vmatmul.mubr.msk.f32.vlgmr.msra.gmra.mrb[20].mxu1 %vm978_vm4, %v2016_v45 }
 0x53b   : > { %2705 = vmatprep.mubr.msk.f32.mxu1 %vm3368_vm6, %v3369_v47 }
 0x60d   : > { %v2700_v49 = vpop.f32.mrb[20].mxu1 }
 0x60e   : > { %v2107_v51 = vadd.f32 %v2700_v49, %v2027_v48  ;;  %v2101_v52 = vpop.f32.mrb[21].mxu1 }
 0x60f   : > { %v2102_v53 = vadd.f32 %v2101_v52, %v2022_v50 }
 0x610   : > { %v2111_v54 = vmax.f32 %v2107_v51, 0.0 }
 0x611   : > { %v2110_v55 = vmax.f32 %v2102_v53, 0.0 }
 0x613   : > { %v2791_v56 = vpack.c.bf16 %v2111_v54, %v2110_v55 }
 0x615   : > { %2792 = vmatpush3.bf16.msra.mxu1 %v2791_v56 }
 0x618   : > { %2706 = vmatmul.mubr.msk.f32.vlgmr.msra.gmra.mrb[22].mxu1 %vm2119_vm7, %v2112_v57 }
 0x6eb   : > { %v2189_v59 = vpop.f32.mrb[22].mxu1 }
 0x6ec   : > { %v2190_v60 = vadd.f32 %v2189_v59, %v2117_v58  ;;  %v2707_v61 = vpop.f32.mrb[23].mxu1 }
 0x6ee   : > { %2193 = vst [vmem:[%s813_s14] sm:$0xff] %v2190_v60 }
 0x6ef PF: > { %s4082_s20 = sld [smem:[#allocation30_spill]]  ;;  %s4083_s4 = sld [smem:[#allocation31_spill]] }
 0x6f0   : > { %s4084_s0 = smov %s3345_s30 }
 0x6f5   : > { %p33_p0 = scmp.ge.s32.totalorder %s4082_s20, 4   ;;  %s4085_s30 = smov %s4083_s4 }
 0x6f7   :  { %35 = sbr.rel (!%p33_p0) target bundleno = 23 (0x17), region = 218 }
 0x6fe   :  { %2213 = vsyncpa [#allocation4], 1 }
 0x6ff   :  { %2215 = vsyncpa [#allocation4 + $0x1], 1 }
 0x700   :  { %2216 = vsyncpa [#allocation6], 1 }
 0x701   :  { %2217 = vsyncpa [#allocation9], 1 }
 0x702   :  { %2218 = vsyncpa [#allocation12], 1 }
 0x703   :  { %2219 = vsyncpa [#allocation15], 1 }
 0x704   :  { %2220 = vsyncpa [#allocation18], 1 }
 0x705   :  { %2221 = vsyncpa [#allocation21], 1 }

</bundles_post_ra>
